<compile_context>
chip_gen: v7x
topology: tpu7x:2x2x1
jax: 0.10.0
libtpu: 0.0.40
codegen_flags: <defaults>
</compile_context>

<pallas_src>
import math

import jax
import jax.numpy as jnp
from jax.experimental import pallas as pl
from jax.experimental.pallas import tpu as pltpu

EMBED_SIZE = 16
HIDDEN_SIZE = 64
VOCAB_SIZE = 12      # synthetic small vocab; index 0 plays the role of '<eos>' (padding_idx)
VOCAB_PAD = 128      # lane-dense padded vocab width (sliced back to VOCAB_SIZE outside)
GATE_PAD = 128       # each GRU gate padded to one full 128-lane slab
SUBLANE = 8          # batch padded to a multiple of this


def _gru_lm_kernel(tok_ref, h0_ref, gtab_ref, whh_ref, wdec_ref, bdec_ref,
                   logits_ref, hn_ref, gi_scr, hs_scr):
    # Layout:
    #   tok_ref    (T*Bp, 1)  int32  time-major flattened tokens (row = t*Bp + b)
    #   h0_ref     (Bp, H)    f32    initial hidden state
    #   gtab_ref   (Vp, 3G)   bf16   fused (embedding @ W_ih^T), gate slabs [r|z|n]
    #   whh_ref    (H, 3G)    bf16   W_hh^T, gate slabs [r|z|n] at lane 0/128/256
    #   wdec_ref   (H, Vp)    bf16   decision weight (transposed, zero-padded lanes)
    #   bdec_ref   (1, Vp)    f32    decision bias (zero-padded lanes)
    #   logits_ref (Bp, T*Vp) f32    batch-major lane-blocked logits (block t at lanes t*Vp)
    #   hn_ref     (Bp, H)    f32    final hidden state
    #   gi_scr     (T*Bp, 3G) f32    VMEM scratch: hoisted input-gate activations
    #   hs_scr     (T*Bp, H)  bf16   VMEM scratch: per-step hidden states
    TB = tok_ref.shape[0]
    Bp, H = h0_ref.shape
    T = TB // Bp
    G = GATE_PAD

    # --- 1) Embedding gather + input projection fused into ONE MXU pass:
    #        one_hot(tokens) @ (embedding @ W_ih^T).  Result goes straight to VMEM
    #        scratch so it is not live across the unrolled recurrence.
    vocab_iota = jax.lax.broadcasted_iota(jnp.int32, (TB, VOCAB_PAD), 1)
    onehot = (vocab_iota == tok_ref[...]).astype(jnp.bfloat16)            # (TB, Vp)
    gi_scr[...] = jnp.dot(onehot, gtab_ref[...],
                          preferred_element_type=jnp.float32)             # (TB, 3G)

    # --- 2) Serial GRU recurrence.  T is a small static int -> fully unrolled,
    #        static aligned slices; only h (1 vreg) stays live across steps.
    h = h0_ref[...]                                                       # (Bp, H) f32
    for t in range(T):
        gi = gi_scr[pl.ds(t * Bp, Bp), :]                                 # (Bp, 3G) f32
        gh = jnp.dot(h.astype(jnp.bfloat16), whh_ref[...],
                     preferred_element_type=jnp.float32)                  # (Bp, 3G) f32
        # Gate slabs are vreg-aligned (offsets 0 / 128 / 256): no cross-lane XLU ops.
        rz = jax.nn.sigmoid(gi[:, :2 * G] + gh[:, :2 * G])                # (Bp, 2G)
        r = rz[:, :G]
        z = rz[:, G:]
        n = jnp.tanh(gi[:, 2 * G:] + r * gh[:, 2 * G:])                   # (Bp, G)
        n_h = n[:, :H]                                                    # offset-0 narrowing
        z_h = z[:, :H]
        h = n_h + z_h * (h - n_h)              # == (1-z)*n + z*h, one fewer VPU op
        hs_scr[pl.ds(t * Bp, Bp), :] = h.astype(jnp.bfloat16)
    hn_ref[...] = h

    # --- 3) Batched, lane-dense decision epilogue: one (T*Bp, H) x (H, Vp) matmul.
    #        Emit batch-major lane-blocked logits so the wrapper needs no transpose.
    dec = jnp.dot(hs_scr[...], wdec_ref[...],
                  preferred_element_type=jnp.float32) + bdec_ref[...]     # (TB, Vp)
    for t in range(T):
        logits_ref[:, pl.ds(t * VOCAB_PAD, VOCAB_PAD)] = dec[t * Bp:(t + 1) * Bp, :]


def init_params(key):
    """Deterministic synthetic parameters matching LangMod's shapes.

    Returns (raw, fused): raw f32 PyTorch-layout params (for the reference check)
    and the fused/padded bf16 kernel params.
    """
    ks = jax.random.split(key, 5)
    h, e, v = HIDDEN_SIZE, EMBED_SIZE, VOCAB_SIZE
    k = 1.0 / math.sqrt(h)

    emb = 0.1 * jax.random.normal(ks[0], (v, e), jnp.float32)
    emb = emb.at[0].set(0.0)                      # padding_idx == vocab['<eos>'] == 0

    # PyTorch GRU layout: weight_ih_l0 (3H, E), weight_hh_l0 (3H, H), gate order [r, z, n].
    w_ih = jax.random.uniform(ks[1], (3 * h, e), jnp.float32, -k, k)
    w_hh = jax.random.uniform(ks[2], (3 * h, h), jnp.float32, -k, k)
    w_dec = jax.random.uniform(ks[3], (v, h), jnp.float32, -k, k)
    b_dec = jax.random.uniform(ks[4], (v,), jnp.float32, -k, k)

    raw = dict(embedding=emb, w_ih=w_ih, w_hh=w_hh, w_dec=w_dec, b_dec=b_dec)

    def pad_gates(w_t):   # (in, 3H) -> (in, 3*GATE_PAD): gate blocks at lane 0/128/256
        out = jnp.zeros((w_t.shape[0], 3 * GATE_PAD), jnp.float32)
        for g in range(3):
            out = out.at[:, g * GATE_PAD:g * GATE_PAD + h].set(
                w_t[:, g * h:(g + 1) * h])
        return out

    # Fused embedding @ input-weights table: row v = input-gate pre-activations of token v.
    gi_tab = jnp.zeros((VOCAB_PAD, 3 * GATE_PAD), jnp.float32)
    gi_tab = gi_tab.at[:v].set(pad_gates(emb @ w_ih.T))        # row 0 stays all-zero

    w_dec_p = jnp.zeros((h, VOCAB_PAD), jnp.float32).at[:, :v].set(w_dec.T)
    b_dec_p = jnp.zeros((1, VOCAB_PAD), jnp.float32).at[0, :v].set(b_dec)

    fused = dict(
        gi_table=gi_tab.astype(jnp.bfloat16),            # (Vp, 3G)
        w_hh_p=pad_gates(w_hh.T).astype(jnp.bfloat16),   # (H, 3G)
        w_dec_p=w_dec_p.astype(jnp.bfloat16),            # (H, Vp)
        b_dec_p=b_dec_p,                                 # (1, Vp) f32
    )
    return raw, fused


def _forward(fused, x_tokens, h_0=None):
    """x_tokens: (B, T) int32.  Returns (logits (B,T,V), h_n (1,B,H))."""
    B, T = x_tokens.shape
    Bp = max(SUBLANE, ((B + SUBLANE - 1) // SUBLANE) * SUBLANE)

    # Only token prep stays outside the kernel: pad batch (pad token 0 == <eos>,
    # whose fused-table row is zero, so padded rows stay zero through the GRU)
    # and flatten time-major.  Under jit this is one tiny fusion.
    tok = x_tokens.astype(jnp.int32)
    if Bp != B:
        tok = jnp.pad(tok, ((0, Bp - B), (0, 0)))
    tok_col = jnp.transpose(tok).reshape(T * Bp, 1)

    if h_0 is None:
        h0 = jnp.zeros((Bp, HIDDEN_SIZE), jnp.float32)
    else:
        h0 = h_0.reshape(-1, HIDDEN_SIZE).astype(jnp.float32)
        if Bp != B:
            h0 = jnp.pad(h0, ((0, Bp - B), (0, 0)))

    vmem = pl.BlockSpec(memory_space=pltpu.MemorySpace.VMEM)
    logits2d, h_n_pad = pl.pallas_call(
        _gru_lm_kernel,
        out_shape=(
            jax.ShapeDtypeStruct((Bp, T * VOCAB_PAD), jnp.float32),
            jax.ShapeDtypeStruct((Bp, HIDDEN_SIZE), jnp.float32),
        ),
        in_specs=[vmem] * 6,
        out_specs=(vmem, vmem),
        scratch_shapes=[
            pltpu.VMEM((T * Bp, 3 * GATE_PAD), jnp.float32),   # hoisted input gates
            pltpu.VMEM((T * Bp, HIDDEN_SIZE), jnp.bfloat16),   # per-step hidden states
        ],
    )(tok_col, h0, fused["gi_table"], fused["w_hh_p"],
      fused["w_dec_p"], fused["b_dec_p"])

    # (Bp, T*Vp) -> (Bp, T, Vp) is a free view; just slice padding off.
    logits = logits2d.reshape(Bp, T, VOCAB_PAD)[:B, :, :VOCAB_SIZE]
    h_n = h_n_pad[:B]
    return logits, h_n[None, :, :]


lang_mod_forward = jax.jit(_forward)


def reference_forward(raw, x_tokens, h_0=None):
    """Pure-JAX f32 reference matching PyTorch LangMod.forward."""
    B, T = x_tokens.shape
    H = HIDDEN_SIZE
    emb = raw["embedding"][x_tokens]                       # (B, T, E)
    h = (jnp.zeros((B, H), jnp.float32) if h_0 is None
         else h_0.reshape(B, H).astype(jnp.float32))
    w_ih, w_hh = raw["w_ih"], raw["w_hh"]
    hs = []
    for t in range(T):
        gi = emb[:, t, :] @ w_ih.T
        gh = h @ w_hh.T
        r = jax.nn.sigmoid(gi[:, :H] + gh[:, :H])
        z = jax.nn.sigmoid(gi[:, H:2 * H] + gh[:, H:2 * H])
        n = jnp.tanh(gi[:, 2 * H:] + r * gh[:, 2 * H:])
        h = (1.0 - z) * n + z * h
        hs.append(h)
    out = jnp.stack(hs, axis=1)                            # (B, T, H)
    logits = out @ raw["w_dec"].T + raw["b_dec"]
    return logits, h[None, :, :]


if __name__ == "__main__":
    key = jax.random.PRNGKey(0)
    pkey, xkey = jax.random.split(key)
    raw, fused = init_params(pkey)

    B, T = 2, 8
    x_tokens = jax.random.randint(xkey, (B, T), 0, VOCAB_SIZE, dtype=jnp.int32)

    logits, h_n = lang_mod_forward(fused, x_tokens)
    jax.block_until_ready((logits, h_n))

    assert logits.shape == (B, T, VOCAB_SIZE), logits.shape
    assert h_n.shape == (1, B, HIDDEN_SIZE), h_n.shape

    # Tolerance check vs. the pure-JAX f32 reference (bf16 MXU operands in the
    # kernel introduce ~1e-3 drift at these magnitudes).
    ref_logits, ref_hn = reference_forward(raw, x_tokens)
    assert float(jnp.max(jnp.abs(logits - ref_logits))) < 2e-2
    assert float(jnp.max(jnp.abs(h_n - ref_hn))) < 2e-2

    print("KERNEL_OK")
</pallas_src>

<mosaic_0001>
module attributes {stable_mosaic.version = 11 : i64} {
  func.func @_gru_lm_kernel(%arg0: memref<64x1xi32, #tpu.memory_space<vmem>>, %arg1: memref<8x64xf32, #tpu.memory_space<vmem>>, %arg2: memref<128x384xbf16, #tpu.memory_space<vmem>>, %arg3: memref<64x384xbf16, #tpu.memory_space<vmem>>, %arg4: memref<64x128xbf16, #tpu.memory_space<vmem>>, %arg5: memref<1x128xf32, #tpu.memory_space<vmem>>, %arg6: memref<8x1024xf32, #tpu.memory_space<vmem>>, %arg7: memref<8x64xf32, #tpu.memory_space<vmem>>, %arg8: memref<64x384xf32, #tpu.memory_space<vmem>>, %arg9: memref<64x64xbf16, #tpu.memory_space<vmem>>) attributes {dimension_semantics = [], scalar_prefetch = 0 : i64, scratch_operands = 2 : i64, tpu.core_type = #tpu.core_type<tc>} {
    %0 = tpu.iota {dimensions = array<i32: 1>} : vector<64x128xi32>
    %c0 = arith.constant 0 : index
    %c0_0 = arith.constant 0 : index
    %1 = vector.load %arg0[%c0, %c0_0] : memref<64x1xi32, #tpu.memory_space<vmem>>, vector<64x1xi32>
    %2 = vector.broadcast %1 : vector<64x1xi32> to vector<64x128xi32>
    %3 = arith.cmpi eq, %0, %2 : vector<64x128xi32>
    %4 = arith.extui %3 : vector<64x128xi1> to vector<64x128xi32>
    %5 = arith.sitofp %4 : vector<64x128xi32> to vector<64x128xf32>
    %6 = arith.truncf %5 : vector<64x128xf32> to vector<64x128xbf16>
    %c0_1 = arith.constant 0 : index
    %c0_2 = arith.constant 0 : index
    %7 = vector.load %arg2[%c0_1, %c0_2] : memref<128x384xbf16, #tpu.memory_space<vmem>>, vector<128x384xbf16>
    %cst = arith.constant dense<0.000000e+00> : vector<64x384xf32>
    %8 = tpu.matmul %6, %7, %cst {dimension_numbers = #tpu.dot_dimension_numbers<[1], [0], [0], [1], [0, 0, 1, 1], [], []>} : vector<64x128xbf16>, vector<128x384xbf16>, vector<64x384xf32> -> vector<64x384xf32>
    %c0_3 = arith.constant 0 : index
    %c0_4 = arith.constant 0 : index
    %9 = vector.load %arg8[%c0_3, %c0_4] : memref<64x384xf32, #tpu.memory_space<vmem>>, vector<64x384xf32>
    tpu.vector_store %arg8[%c0_3, %c0_4], %8 {strides = array<i32>} : memref<64x384xf32, #tpu.memory_space<vmem>>, vector<64x384xf32>,
    %c0_5 = arith.constant 0 : index
    %c0_6 = arith.constant 0 : index
    %10 = vector.load %arg1[%c0_5, %c0_6] : memref<8x64xf32, #tpu.memory_space<vmem>>, vector<8x64xf32>
    %c0_7 = arith.constant 0 : index
    %c0_8 = arith.constant 0 : index
    %11 = vector.load %arg8[%c0_7, %c0_8] : memref<64x384xf32, #tpu.memory_space<vmem>>, vector<8x384xf32>
    %12 = arith.truncf %10 : vector<8x64xf32> to vector<8x64xbf16>
    %c0_9 = arith.constant 0 : index
    %c0_10 = arith.constant 0 : index
    %13 = vector.load %arg3[%c0_9, %c0_10] : memref<64x384xbf16, #tpu.memory_space<vmem>>, vector<64x384xbf16>
    %cst_11 = arith.constant dense<0.000000e+00> : vector<8x384xf32>
    %14 = tpu.matmul %12, %13, %cst_11 {dimension_numbers = #tpu.dot_dimension_numbers<[1], [0], [0], [1], [0, 0, 1, 1], [], []>} : vector<8x64xbf16>, vector<64x384xbf16>, vector<8x384xf32> -> vector<8x384xf32>
    %15 = vector.extract_strided_slice %11 {offsets = [0, 0], sizes = [8, 256], strides = [1, 1]} : vector<8x384xf32> to vector<8x256xf32>
    %16 = vector.extract_strided_slice %14 {offsets = [0, 0], sizes = [8, 256], strides = [1, 1]} : vector<8x384xf32> to vector<8x256xf32>
    %17 = arith.addf %15, %16 : vector<8x256xf32>
    %18 = arith.negf %17 : vector<8x256xf32>
    %19 = math.exp %18 : vector<8x256xf32>
    %cst_12 = arith.constant 1.000000e+00 : f32
    %20 = vector.broadcast %cst_12 : f32 to vector<8x256xf32>
    %21 = arith.addf %20, %19 : vector<8x256xf32>
    %22 = arith.divf %20, %21 : vector<8x256xf32>
    %23 = vector.extract_strided_slice %22 {offsets = [0, 0], sizes = [8, 128], strides = [1, 1]} : vector<8x256xf32> to vector<8x128xf32>
    %24 = vector.extract_strided_slice %22 {offsets = [0, 128], sizes = [8, 128], strides = [1, 1]} : vector<8x256xf32> to vector<8x128xf32>
    %25 = vector.extract_strided_slice %11 {offsets = [0, 256], sizes = [8, 128], strides = [1, 1]} : vector<8x384xf32> to vector<8x128xf32>
    %26 = vector.extract_strided_slice %14 {offsets = [0, 256], sizes = [8, 128], strides = [1, 1]} : vector<8x384xf32> to vector<8x128xf32>
    %27 = arith.mulf %23, %26 : vector<8x128xf32>
    %28 = arith.addf %25, %27 : vector<8x128xf32>
    %29 = math.tanh %28 : vector<8x128xf32>
    %30 = vector.extract_strided_slice %29 {offsets = [0, 0], sizes = [8, 64], strides = [1, 1]} : vector<8x128xf32> to vector<8x64xf32>
    %31 = vector.extract_strided_slice %24 {offsets = [0, 0], sizes = [8, 64], strides = [1, 1]} : vector<8x128xf32> to vector<8x64xf32>
    %32 = arith.subf %10, %30 : vector<8x64xf32>
    %33 = arith.mulf %31, %32 : vector<8x64xf32>
    %34 = arith.addf %30, %33 : vector<8x64xf32>
    %35 = arith.truncf %34 : vector<8x64xf32> to vector<8x64xbf16>
    %c0_13 = arith.constant 0 : index
    %c0_14 = arith.constant 0 : index
    %36 = vector.load %arg9[%c0_13, %c0_14] : memref<64x64xbf16, #tpu.memory_space<vmem>>, vector<8x64xbf16>
    tpu.vector_store %arg9[%c0_13, %c0_14], %35 {strides = array<i32>} : memref<64x64xbf16, #tpu.memory_space<vmem>>, vector<8x64xbf16>,
    %c8 = arith.constant 8 : index
    %c0_15 = arith.constant 0 : index
    %37 = vector.load %arg8[%c8, %c0_15] : memref<64x384xf32, #tpu.memory_space<vmem>>, vector<8x384xf32>
    %38 = arith.truncf %34 : vector<8x64xf32> to vector<8x64xbf16>
    %c0_16 = arith.constant 0 : index
    %c0_17 = arith.constant 0 : index
    %39 = vector.load %arg3[%c0_16, %c0_17] : memref<64x384xbf16, #tpu.memory_space<vmem>>, vector<64x384xbf16>
    %cst_18 = arith.constant dense<0.000000e+00> : vector<8x384xf32>
    %40 = tpu.matmul %38, %39, %cst_18 {dimension_numbers = #tpu.dot_dimension_numbers<[1], [0], [0], [1], [0, 0, 1, 1], [], []>} : vector<8x64xbf16>, vector<64x384xbf16>, vector<8x384xf32> -> vector<8x384xf32>
    %41 = vector.extract_strided_slice %37 {offsets = [0, 0], sizes = [8, 256], strides = [1, 1]} : vector<8x384xf32> to vector<8x256xf32>
    %42 = vector.extract_strided_slice %40 {offsets = [0, 0], sizes = [8, 256], strides = [1, 1]} : vector<8x384xf32> to vector<8x256xf32>
    %43 = arith.addf %41, %42 : vector<8x256xf32>
    %44 = arith.negf %43 : vector<8x256xf32>
    %45 = math.exp %44 : vector<8x256xf32>
    %cst_19 = arith.constant 1.000000e+00 : f32
    %46 = vector.broadcast %cst_19 : f32 to vector<8x256xf32>
    %47 = arith.addf %46, %45 : vector<8x256xf32>
    %48 = arith.divf %46, %47 : vector<8x256xf32>
    %49 = vector.extract_strided_slice %48 {offsets = [0, 0], sizes = [8, 128], strides = [1, 1]} : vector<8x256xf32> to vector<8x128xf32>
    %50 = vector.extract_strided_slice %48 {offsets = [0, 128], sizes = [8, 128], strides = [1, 1]} : vector<8x256xf32> to vector<8x128xf32>
    %51 = vector.extract_strided_slice %37 {offsets = [0, 256], sizes = [8, 128], strides = [1, 1]} : vector<8x384xf32> to vector<8x128xf32>
    %52 = vector.extract_strided_slice %40 {offsets = [0, 256], sizes = [8, 128], strides = [1, 1]} : vector<8x384xf32> to vector<8x128xf32>
    %53 = arith.mulf %49, %52 : vector<8x128xf32>
    %54 = arith.addf %51, %53 : vector<8x128xf32>
    %55 = math.tanh %54 : vector<8x128xf32>
    %56 = vector.extract_strided_slice %55 {offsets = [0, 0], sizes = [8, 64], strides = [1, 1]} : vector<8x128xf32> to vector<8x64xf32>
    %57 = vector.extract_strided_slice %50 {offsets = [0, 0], sizes = [8, 64], strides = [1, 1]} : vector<8x128xf32> to vector<8x64xf32>
    %58 = arith.subf %34, %56 : vector<8x64xf32>
    %59 = arith.mulf %57, %58 : vector<8x64xf32>
    %60 = arith.addf %56, %59 : vector<8x64xf32>
    %61 = arith.truncf %60 : vector<8x64xf32> to vector<8x64xbf16>
    %c8_20 = arith.constant 8 : index
    %c0_21 = arith.constant 0 : index
    %62 = vector.load %arg9[%c8_20, %c0_21] : memref<64x64xbf16, #tpu.memory_space<vmem>>, vector<8x64xbf16>
    tpu.vector_store %arg9[%c8_20, %c0_21], %61 {strides = array<i32>} : memref<64x64xbf16, #tpu.memory_space<vmem>>, vector<8x64xbf16>,
    %c16 = arith.constant 16 : index
    %c0_22 = arith.constant 0 : index
    %63 = vector.load %arg8[%c16, %c0_22] : memref<64x384xf32, #tpu.memory_space<vmem>>, vector<8x384xf32>
    %64 = arith.truncf %60 : vector<8x64xf32> to vector<8x64xbf16>
    %c0_23 = arith.constant 0 : index
    %c0_24 = arith.constant 0 : index
    %65 = vector.load %arg3[%c0_23, %c0_24] : memref<64x384xbf16, #tpu.memory_space<vmem>>, vector<64x384xbf16>
    %cst_25 = arith.constant dense<0.000000e+00> : vector<8x384xf32>
    %66 = tpu.matmul %64, %65, %cst_25 {dimension_numbers = #tpu.dot_dimension_numbers<[1], [0], [0], [1], [0, 0, 1, 1], [], []>} : vector<8x64xbf16>, vector<64x384xbf16>, vector<8x384xf32> -> vector<8x384xf32>
    %67 = vector.extract_strided_slice %63 {offsets = [0, 0], sizes = [8, 256], strides = [1, 1]} : vector<8x384xf32> to vector<8x256xf32>
    %68 = vector.extract_strided_slice %66 {offsets = [0, 0], sizes = [8, 256], strides = [1, 1]} : vector<8x384xf32> to vector<8x256xf32>
    %69 = arith.addf %67, %68 : vector<8x256xf32>
    %70 = arith.negf %69 : vector<8x256xf32>
    %71 = math.exp %70 : vector<8x256xf32>
    %cst_26 = arith.constant 1.000000e+00 : f32
    %72 = vector.broadcast %cst_26 : f32 to vector<8x256xf32>
    %73 = arith.addf %72, %71 : vector<8x256xf32>
    %74 = arith.divf %72, %73 : vector<8x256xf32>
    %75 = vector.extract_strided_slice %74 {offsets = [0, 0], sizes = [8, 128], strides = [1, 1]} : vector<8x256xf32> to vector<8x128xf32>
    %76 = vector.extract_strided_slice %74 {offsets = [0, 128], sizes = [8, 128], strides = [1, 1]} : vector<8x256xf32> to vector<8x128xf32>
    %77 = vector.extract_strided_slice %63 {offsets = [0, 256], sizes = [8, 128], strides = [1, 1]} : vector<8x384xf32> to vector<8x128xf32>
    %78 = vector.extract_strided_slice %66 {offsets = [0, 256], sizes = [8, 128], strides = [1, 1]} : vector<8x384xf32> to vector<8x128xf32>
    %79 = arith.mulf %75, %78 : vector<8x128xf32>
    %80 = arith.addf %77, %79 : vector<8x128xf32>
    %81 = math.tanh %80 : vector<8x128xf32>
    %82 = vector.extract_strided_slice %81 {offsets = [0, 0], sizes = [8, 64], strides = [1, 1]} : vector<8x128xf32> to vector<8x64xf32>
    %83 = vector.extract_strided_slice %76 {offsets = [0, 0], sizes = [8, 64], strides = [1, 1]} : vector<8x128xf32> to vector<8x64xf32>
    %84 = arith.subf %60, %82 : vector<8x64xf32>
    %85 = arith.mulf %83, %84 : vector<8x64xf32>
    %86 = arith.addf %82, %85 : vector<8x64xf32>
    %87 = arith.truncf %86 : vector<8x64xf32> to vector<8x64xbf16>
    %c16_27 = arith.constant 16 : index
    %c0_28 = arith.constant 0 : index
    %88 = vector.load %arg9[%c16_27, %c0_28] : memref<64x64xbf16, #tpu.memory_space<vmem>>, vector<8x64xbf16>
    tpu.vector_store %arg9[%c16_27, %c0_28], %87 {strides = array<i32>} : memref<64x64xbf16, #tpu.memory_space<vmem>>, vector<8x64xbf16>,
    %c24 = arith.constant 24 : index
    %c0_29 = arith.constant 0 : index
    %89 = vector.load %arg8[%c24, %c0_29] : memref<64x384xf32, #tpu.memory_space<vmem>>, vector<8x384xf32>
    %90 = arith.truncf %86 : vector<8x64xf32> to vector<8x64xbf16>
    %c0_30 = arith.constant 0 : index
    %c0_31 = arith.constant 0 : index
    %91 = vector.load %arg3[%c0_30, %c0_31] : memref<64x384xbf16, #tpu.memory_space<vmem>>, vector<64x384xbf16>
    %cst_32 = arith.constant dense<0.000000e+00> : vector<8x384xf32>
    %92 = tpu.matmul %90, %91, %cst_32 {dimension_numbers = #tpu.dot_dimension_numbers<[1], [0], [0], [1], [0, 0, 1, 1], [], []>} : vector<8x64xbf16>, vector<64x384xbf16>, vector<8x384xf32> -> vector<8x384xf32>
    %93 = vector.extract_strided_slice %89 {offsets = [0, 0], sizes = [8, 256], strides = [1, 1]} : vector<8x384xf32> to vector<8x256xf32>
    %94 = vector.extract_strided_slice %92 {offsets = [0, 0], sizes = [8, 256], strides = [1, 1]} : vector<8x384xf32> to vector<8x256xf32>
    %95 = arith.addf %93, %94 : vector<8x256xf32>
    %96 = arith.negf %95 : vector<8x256xf32>
    %97 = math.exp %96 : vector<8x256xf32>
    %cst_33 = arith.constant 1.000000e+00 : f32
    %98 = vector.broadcast %cst_33 : f32 to vector<8x256xf32>
    %99 = arith.addf %98, %97 : vector<8x256xf32>
    %100 = arith.divf %98, %99 : vector<8x256xf32>
    %101 = vector.extract_strided_slice %100 {offsets = [0, 0], sizes = [8, 128], strides = [1, 1]} : vector<8x256xf32> to vector<8x128xf32>
    %102 = vector.extract_strided_slice %100 {offsets = [0, 128], sizes = [8, 128], strides = [1, 1]} : vector<8x256xf32> to vector<8x128xf32>
    %103 = vector.extract_strided_slice %89 {offsets = [0, 256], sizes = [8, 128], strides = [1, 1]} : vector<8x384xf32> to vector<8x128xf32>
    %104 = vector.extract_strided_slice %92 {offsets = [0, 256], sizes = [8, 128], strides = [1, 1]} : vector<8x384xf32> to vector<8x128xf32>
    %105 = arith.mulf %101, %104 : vector<8x128xf32>
    %106 = arith.addf %103, %105 : vector<8x128xf32>
    %107 = math.tanh %106 : vector<8x128xf32>
    %108 = vector.extract_strided_slice %107 {offsets = [0, 0], sizes = [8, 64], strides = [1, 1]} : vector<8x128xf32> to vector<8x64xf32>
    %109 = vector.extract_strided_slice %102 {offsets = [0, 0], sizes = [8, 64], strides = [1, 1]} : vector<8x128xf32> to vector<8x64xf32>
    %110 = arith.subf %86, %108 : vector<8x64xf32>
    %111 = arith.mulf %109, %110 : vector<8x64xf32>
    %112 = arith.addf %108, %111 : vector<8x64xf32>
    %113 = arith.truncf %112 : vector<8x64xf32> to vector<8x64xbf16>
    %c24_34 = arith.constant 24 : index
    %c0_35 = arith.constant 0 : index
    %114 = vector.load %arg9[%c24_34, %c0_35] : memref<64x64xbf16, #tpu.memory_space<vmem>>, vector<8x64xbf16>
    tpu.vector_store %arg9[%c24_34, %c0_35], %113 {strides = array<i32>} : memref<64x64xbf16, #tpu.memory_space<vmem>>, vector<8x64xbf16>,
    %c32 = arith.constant 32 : index
    %c0_36 = arith.constant 0 : index
    %115 = vector.load %arg8[%c32, %c0_36] : memref<64x384xf32, #tpu.memory_space<vmem>>, vector<8x384xf32>
    %116 = arith.truncf %112 : vector<8x64xf32> to vector<8x64xbf16>
    %c0_37 = arith.constant 0 : index
    %c0_38 = arith.constant 0 : index
    %117 = vector.load %arg3[%c0_37, %c0_38] : memref<64x384xbf16, #tpu.memory_space<vmem>>, vector<64x384xbf16>
    %cst_39 = arith.constant dense<0.000000e+00> : vector<8x384xf32>
    %118 = tpu.matmul %116, %117, %cst_39 {dimension_numbers = #tpu.dot_dimension_numbers<[1], [0], [0], [1], [0, 0, 1, 1], [], []>} : vector<8x64xbf16>, vector<64x384xbf16>, vector<8x384xf32> -> vector<8x384xf32>
    %119 = vector.extract_strided_slice %115 {offsets = [0, 0], sizes = [8, 256], strides = [1, 1]} : vector<8x384xf32> to vector<8x256xf32>
    %120 = vector.extract_strided_slice %118 {offsets = [0, 0], sizes = [8, 256], strides = [1, 1]} : vector<8x384xf32> to vector<8x256xf32>
    %121 = arith.addf %119, %120 : vector<8x256xf32>
    %122 = arith.negf %121 : vector<8x256xf32>
    %123 = math.exp %122 : vector<8x256xf32>
    %cst_40 = arith.constant 1.000000e+00 : f32
    %124 = vector.broadcast %cst_40 : f32 to vector<8x256xf32>
    %125 = arith.addf %124, %123 : vector<8x256xf32>
    %126 = arith.divf %124, %125 : vector<8x256xf32>
    %127 = vector.extract_strided_slice %126 {offsets = [0, 0], sizes = [8, 128], strides = [1, 1]} : vector<8x256xf32> to vector<8x128xf32>
    %128 = vector.extract_strided_slice %126 {offsets = [0, 128], sizes = [8, 128], strides = [1, 1]} : vector<8x256xf32> to vector<8x128xf32>
    %129 = vector.extract_strided_slice %115 {offsets = [0, 256], sizes = [8, 128], strides = [1, 1]} : vector<8x384xf32> to vector<8x128xf32>
    %130 = vector.extract_strided_slice %118 {offsets = [0, 256], sizes = [8, 128], strides = [1, 1]} : vector<8x384xf32> to vector<8x128xf32>
    %131 = arith.mulf %127, %130 : vector<8x128xf32>
    %132 = arith.addf %129, %131 : vector<8x128xf32>
    %133 = math.tanh %132 : vector<8x128xf32>
    %134 = vector.extract_strided_slice %133 {offsets = [0, 0], sizes = [8, 64], strides = [1, 1]} : vector<8x128xf32> to vector<8x64xf32>
    %135 = vector.extract_strided_slice %128 {offsets = [0, 0], sizes = [8, 64], strides = [1, 1]} : vector<8x128xf32> to vector<8x64xf32>
    %136 = arith.subf %112, %134 : vector<8x64xf32>
    %137 = arith.mulf %135, %136 : vector<8x64xf32>
    %138 = arith.addf %134, %137 : vector<8x64xf32>
    %139 = arith.truncf %138 : vector<8x64xf32> to vector<8x64xbf16>
    %c32_41 = arith.constant 32 : index
    %c0_42 = arith.constant 0 : index
    %140 = vector.load %arg9[%c32_41, %c0_42] : memref<64x64xbf16, #tpu.memory_space<vmem>>, vector<8x64xbf16>
    tpu.vector_store %arg9[%c32_41, %c0_42], %139 {strides = array<i32>} : memref<64x64xbf16, #tpu.memory_space<vmem>>, vector<8x64xbf16>,
    %c40 = arith.constant 40 : index
    %c0_43 = arith.constant 0 : index
    %141 = vector.load %arg8[%c40, %c0_43] : memref<64x384xf32, #tpu.memory_space<vmem>>, vector<8x384xf32>
    %142 = arith.truncf %138 : vector<8x64xf32> to vector<8x64xbf16>
    %c0_44 = arith.constant 0 : index
    %c0_45 = arith.constant 0 : index
    %143 = vector.load %arg3[%c0_44, %c0_45] : memref<64x384xbf16, #tpu.memory_space<vmem>>, vector<64x384xbf16>
    %cst_46 = arith.constant dense<0.000000e+00> : vector<8x384xf32>
    %144 = tpu.matmul %142, %143, %cst_46 {dimension_numbers = #tpu.dot_dimension_numbers<[1], [0], [0], [1], [0, 0, 1, 1], [], []>} : vector<8x64xbf16>, vector<64x384xbf16>, vector<8x384xf32> -> vector<8x384xf32>
    %145 = vector.extract_strided_slice %141 {offsets = [0, 0], sizes = [8, 256], strides = [1, 1]} : vector<8x384xf32> to vector<8x256xf32>
    %146 = vector.extract_strided_slice %144 {offsets = [0, 0], sizes = [8, 256], strides = [1, 1]} : vector<8x384xf32> to vector<8x256xf32>
    %147 = arith.addf %145, %146 : vector<8x256xf32>
    %148 = arith.negf %147 : vector<8x256xf32>
    %149 = math.exp %148 : vector<8x256xf32>
    %cst_47 = arith.constant 1.000000e+00 : f32
    %150 = vector.broadcast %cst_47 : f32 to vector<8x256xf32>
    %151 = arith.addf %150, %149 : vector<8x256xf32>
    %152 = arith.divf %150, %151 : vector<8x256xf32>
    %153 = vector.extract_strided_slice %152 {offsets = [0, 0], sizes = [8, 128], strides = [1, 1]} : vector<8x256xf32> to vector<8x128xf32>
    %154 = vector.extract_strided_slice %152 {offsets = [0, 128], sizes = [8, 128], strides = [1, 1]} : vector<8x256xf32> to vector<8x128xf32>
    %155 = vector.extract_strided_slice %141 {offsets = [0, 256], sizes = [8, 128], strides = [1, 1]} : vector<8x384xf32> to vector<8x128xf32>
    %156 = vector.extract_strided_slice %144 {offsets = [0, 256], sizes = [8, 128], strides = [1, 1]} : vector<8x384xf32> to vector<8x128xf32>
    %157 = arith.mulf %153, %156 : vector<8x128xf32>
    %158 = arith.addf %155, %157 : vector<8x128xf32>
    %159 = math.tanh %158 : vector<8x128xf32>
    %160 = vector.extract_strided_slice %159 {offsets = [0, 0], sizes = [8, 64], strides = [1, 1]} : vector<8x128xf32> to vector<8x64xf32>
    %161 = vector.extract_strided_slice %154 {offsets = [0, 0], sizes = [8, 64], strides = [1, 1]} : vector<8x128xf32> to vector<8x64xf32>
    %162 = arith.subf %138, %160 : vector<8x64xf32>
    %163 = arith.mulf %161, %162 : vector<8x64xf32>
    %164 = arith.addf %160, %163 : vector<8x64xf32>
    %165 = arith.truncf %164 : vector<8x64xf32> to vector<8x64xbf16>
    %c40_48 = arith.constant 40 : index
    %c0_49 = arith.constant 0 : index
    %166 = vector.load %arg9[%c40_48, %c0_49] : memref<64x64xbf16, #tpu.memory_space<vmem>>, vector<8x64xbf16>
    tpu.vector_store %arg9[%c40_48, %c0_49], %165 {strides = array<i32>} : memref<64x64xbf16, #tpu.memory_space<vmem>>, vector<8x64xbf16>,
    %c48 = arith.constant 48 : index
    %c0_50 = arith.constant 0 : index
    %167 = vector.load %arg8[%c48, %c0_50] : memref<64x384xf32, #tpu.memory_space<vmem>>, vector<8x384xf32>
    %168 = arith.truncf %164 : vector<8x64xf32> to vector<8x64xbf16>
    %c0_51 = arith.constant 0 : index
    %c0_52 = arith.constant 0 : index
    %169 = vector.load %arg3[%c0_51, %c0_52] : memref<64x384xbf16, #tpu.memory_space<vmem>>, vector<64x384xbf16>
    %cst_53 = arith.constant dense<0.000000e+00> : vector<8x384xf32>
    %170 = tpu.matmul %168, %169, %cst_53 {dimension_numbers = #tpu.dot_dimension_numbers<[1], [0], [0], [1], [0, 0, 1, 1], [], []>} : vector<8x64xbf16>, vector<64x384xbf16>, vector<8x384xf32> -> vector<8x384xf32>
    %171 = vector.extract_strided_slice %167 {offsets = [0, 0], sizes = [8, 256], strides = [1, 1]} : vector<8x384xf32> to vector<8x256xf32>
    %172 = vector.extract_strided_slice %170 {offsets = [0, 0], sizes = [8, 256], strides = [1, 1]} : vector<8x384xf32> to vector<8x256xf32>
    %173 = arith.addf %171, %172 : vector<8x256xf32>
    %174 = arith.negf %173 : vector<8x256xf32>
    %175 = math.exp %174 : vector<8x256xf32>
    %cst_54 = arith.constant 1.000000e+00 : f32
    %176 = vector.broadcast %cst_54 : f32 to vector<8x256xf32>
    %177 = arith.addf %176, %175 : vector<8x256xf32>
    %178 = arith.divf %176, %177 : vector<8x256xf32>
    %179 = vector.extract_strided_slice %178 {offsets = [0, 0], sizes = [8, 128], strides = [1, 1]} : vector<8x256xf32> to vector<8x128xf32>
    %180 = vector.extract_strided_slice %178 {offsets = [0, 128], sizes = [8, 128], strides = [1, 1]} : vector<8x256xf32> to vector<8x128xf32>
    %181 = vector.extract_strided_slice %167 {offsets = [0, 256], sizes = [8, 128], strides = [1, 1]} : vector<8x384xf32> to vector<8x128xf32>
    %182 = vector.extract_strided_slice %170 {offsets = [0, 256], sizes = [8, 128], strides = [1, 1]} : vector<8x384xf32> to vector<8x128xf32>
    %183 = arith.mulf %179, %182 : vector<8x128xf32>
    %184 = arith.addf %181, %183 : vector<8x128xf32>
    %185 = math.tanh %184 : vector<8x128xf32>
    %186 = vector.extract_strided_slice %185 {offsets = [0, 0], sizes = [8, 64], strides = [1, 1]} : vector<8x128xf32> to vector<8x64xf32>
    %187 = vector.extract_strided_slice %180 {offsets = [0, 0], sizes = [8, 64], strides = [1, 1]} : vector<8x128xf32> to vector<8x64xf32>
    %188 = arith.subf %164, %186 : vector<8x64xf32>
    %189 = arith.mulf %187, %188 : vector<8x64xf32>
    %190 = arith.addf %186, %189 : vector<8x64xf32>
    %191 = arith.truncf %190 : vector<8x64xf32> to vector<8x64xbf16>
    %c48_55 = arith.constant 48 : index
    %c0_56 = arith.constant 0 : index
    %192 = vector.load %arg9[%c48_55, %c0_56] : memref<64x64xbf16, #tpu.memory_space<vmem>>, vector<8x64xbf16>
    tpu.vector_store %arg9[%c48_55, %c0_56], %191 {strides = array<i32>} : memref<64x64xbf16, #tpu.memory_space<vmem>>, vector<8x64xbf16>,
    %c56 = arith.constant 56 : index
    %c0_57 = arith.constant 0 : index
    %193 = vector.load %arg8[%c56, %c0_57] : memref<64x384xf32, #tpu.memory_space<vmem>>, vector<8x384xf32>
    %194 = arith.truncf %190 : vector<8x64xf32> to vector<8x64xbf16>
    %c0_58 = arith.constant 0 : index
    %c0_59 = arith.constant 0 : index
    %195 = vector.load %arg3[%c0_58, %c0_59] : memref<64x384xbf16, #tpu.memory_space<vmem>>, vector<64x384xbf16>
    %cst_60 = arith.constant dense<0.000000e+00> : vector<8x384xf32>
    %196 = tpu.matmul %194, %195, %cst_60 {dimension_numbers = #tpu.dot_dimension_numbers<[1], [0], [0], [1], [0, 0, 1, 1], [], []>} : vector<8x64xbf16>, vector<64x384xbf16>, vector<8x384xf32> -> vector<8x384xf32>
    %197 = vector.extract_strided_slice %193 {offsets = [0, 0], sizes = [8, 256], strides = [1, 1]} : vector<8x384xf32> to vector<8x256xf32>
    %198 = vector.extract_strided_slice %196 {offsets = [0, 0], sizes = [8, 256], strides = [1, 1]} : vector<8x384xf32> to vector<8x256xf32>
    %199 = arith.addf %197, %198 : vector<8x256xf32>
    %200 = arith.negf %199 : vector<8x256xf32>
    %201 = math.exp %200 : vector<8x256xf32>
    %cst_61 = arith.constant 1.000000e+00 : f32
    %202 = vector.broadcast %cst_61 : f32 to vector<8x256xf32>
    %203 = arith.addf %202, %201 : vector<8x256xf32>
    %204 = arith.divf %202, %203 : vector<8x256xf32>
    %205 = vector.extract_strided_slice %204 {offsets = [0, 0], sizes = [8, 128], strides = [1, 1]} : vector<8x256xf32> to vector<8x128xf32>
    %206 = vector.extract_strided_slice %204 {offsets = [0, 128], sizes = [8, 128], strides = [1, 1]} : vector<8x256xf32> to vector<8x128xf32>
    %207 = vector.extract_strided_slice %193 {offsets = [0, 256], sizes = [8, 128], strides = [1, 1]} : vector<8x384xf32> to vector<8x128xf32>
    %208 = vector.extract_strided_slice %196 {offsets = [0, 256], sizes = [8, 128], strides = [1, 1]} : vector<8x384xf32> to vector<8x128xf32>
    %209 = arith.mulf %205, %208 : vector<8x128xf32>
    %210 = arith.addf %207, %209 : vector<8x128xf32>
    %211 = math.tanh %210 : vector<8x128xf32>
    %212 = vector.extract_strided_slice %211 {offsets = [0, 0], sizes = [8, 64], strides = [1, 1]} : vector<8x128xf32> to vector<8x64xf32>
    %213 = vector.extract_strided_slice %206 {offsets = [0, 0], sizes = [8, 64], strides = [1, 1]} : vector<8x128xf32> to vector<8x64xf32>
    %214 = arith.subf %190, %212 : vector<8x64xf32>
    %215 = arith.mulf %213, %214 : vector<8x64xf32>
    %216 = arith.addf %212, %215 : vector<8x64xf32>
    %217 = arith.truncf %216 : vector<8x64xf32> to vector<8x64xbf16>
    %c56_62 = arith.constant 56 : index
    %c0_63 = arith.constant 0 : index
    %218 = vector.load %arg9[%c56_62, %c0_63] : memref<64x64xbf16, #tpu.memory_space<vmem>>, vector<8x64xbf16>
    tpu.vector_store %arg9[%c56_62, %c0_63], %217 {strides = array<i32>} : memref<64x64xbf16, #tpu.memory_space<vmem>>, vector<8x64xbf16>,
    %c0_64 = arith.constant 0 : index
    %c0_65 = arith.constant 0 : index
    %219 = vector.load %arg7[%c0_64, %c0_65] : memref<8x64xf32, #tpu.memory_space<vmem>>, vector<8x64xf32>
    tpu.vector_store %arg7[%c0_64, %c0_65], %216 {strides = array<i32>} : memref<8x64xf32, #tpu.memory_space<vmem>>, vector<8x64xf32>,
    %c0_66 = arith.constant 0 : index
    %c0_67 = arith.constant 0 : index
    %220 = vector.load %arg9[%c0_66, %c0_67] : memref<64x64xbf16, #tpu.memory_space<vmem>>, vector<64x64xbf16>
    %c0_68 = arith.constant 0 : index
    %c0_69 = arith.constant 0 : index
    %221 = vector.load %arg4[%c0_68, %c0_69] : memref<64x128xbf16, #tpu.memory_space<vmem>>, vector<64x128xbf16>
    %cst_70 = arith.constant dense<0.000000e+00> : vector<64x128xf32>
    %222 = tpu.matmul %220, %221, %cst_70 {dimension_numbers = #tpu.dot_dimension_numbers<[1], [0], [0], [1], [0, 0, 1, 1], [], []>} : vector<64x64xbf16>, vector<64x128xbf16>, vector<64x128xf32> -> vector<64x128xf32>
    %c0_71 = arith.constant 0 : index
    %c0_72 = arith.constant 0 : index
    %223 = vector.load %arg5[%c0_71, %c0_72] : memref<1x128xf32, #tpu.memory_space<vmem>>, vector<1x128xf32>
    %224 = vector.broadcast %223 : vector<1x128xf32> to vector<64x128xf32>
    %225 = arith.addf %222, %224 : vector<64x128xf32>
    %226 = vector.extract_strided_slice %225 {offsets = [0, 0], sizes = [8, 128], strides = [1, 1]} : vector<64x128xf32> to vector<8x128xf32>
    %c0_73 = arith.constant 0 : index
    %c0_74 = arith.constant 0 : index
    %227 = vector.load %arg6[%c0_73, %c0_74] : memref<8x1024xf32, #tpu.memory_space<vmem>>, vector<8x128xf32>
    tpu.vector_store %arg6[%c0_73, %c0_74], %226 {strides = array<i32>} : memref<8x1024xf32, #tpu.memory_space<vmem>>, vector<8x128xf32>,
    %228 = vector.extract_strided_slice %225 {offsets = [8, 0], sizes = [8, 128], strides = [1, 1]} : vector<64x128xf32> to vector<8x128xf32>
    %c0_75 = arith.constant 0 : index
    %c128 = arith.constant 128 : index
    %229 = vector.load %arg6[%c0_75, %c128] : memref<8x1024xf32, #tpu.memory_space<vmem>>, vector<8x128xf32>
    tpu.vector_store %arg6[%c0_75, %c128], %228 {strides = array<i32>} : memref<8x1024xf32, #tpu.memory_space<vmem>>, vector<8x128xf32>,
    %230 = vector.extract_strided_slice %225 {offsets = [16, 0], sizes = [8, 128], strides = [1, 1]} : vector<64x128xf32> to vector<8x128xf32>
    %c0_76 = arith.constant 0 : index
    %c256 = arith.constant 256 : index
    %231 = vector.load %arg6[%c0_76, %c256] : memref<8x1024xf32, #tpu.memory_space<vmem>>, vector<8x128xf32>
    tpu.vector_store %arg6[%c0_76, %c256], %230 {strides = array<i32>} : memref<8x1024xf32, #tpu.memory_space<vmem>>, vector<8x128xf32>,
    %232 = vector.extract_strided_slice %225 {offsets = [24, 0], sizes = [8, 128], strides = [1, 1]} : vector<64x128xf32> to vector<8x128xf32>
    %c0_77 = arith.constant 0 : index
    %c384 = arith.constant 384 : index
    %233 = vector.load %arg6[%c0_77, %c384] : memref<8x1024xf32, #tpu.memory_space<vmem>>, vector<8x128xf32>
    tpu.vector_store %arg6[%c0_77, %c384], %232 {strides = array<i32>} : memref<8x1024xf32, #tpu.memory_space<vmem>>, vector<8x128xf32>,
    %234 = vector.extract_strided_slice %225 {offsets = [32, 0], sizes = [8, 128], strides = [1, 1]} : vector<64x128xf32> to vector<8x128xf32>
    %c0_78 = arith.constant 0 : index
    %c512 = arith.constant 512 : index
    %235 = vector.load %arg6[%c0_78, %c512] : memref<8x1024xf32, #tpu.memory_space<vmem>>, vector<8x128xf32>
    tpu.vector_store %arg6[%c0_78, %c512], %234 {strides = array<i32>} : memref<8x1024xf32, #tpu.memory_space<vmem>>, vector<8x128xf32>,
    %236 = vector.extract_strided_slice %225 {offsets = [40, 0], sizes = [8, 128], strides = [1, 1]} : vector<64x128xf32> to vector<8x128xf32>
    %c0_79 = arith.constant 0 : index
    %c640 = arith.constant 640 : index
    %237 = vector.load %arg6[%c0_79, %c640] : memref<8x1024xf32, #tpu.memory_space<vmem>>, vector<8x128xf32>
    tpu.vector_store %arg6[%c0_79, %c640], %236 {strides = array<i32>} : memref<8x1024xf32, #tpu.memory_space<vmem>>, vector<8x128xf32>,
    %238 = vector.extract_strided_slice %225 {offsets = [48, 0], sizes = [8, 128], strides = [1, 1]} : vector<64x128xf32> to vector<8x128xf32>
    %c0_80 = arith.constant 0 : index
    %c768 = arith.constant 768 : index
    %239 = vector.load %arg6[%c0_80, %c768] : memref<8x1024xf32, #tpu.memory_space<vmem>>, vector<8x128xf32>
    tpu.vector_store %arg6[%c0_80, %c768], %238 {strides = array<i32>} : memref<8x1024xf32, #tpu.memory_space<vmem>>, vector<8x128xf32>,
    %240 = vector.extract_strided_slice %225 {offsets = [56, 0], sizes = [8, 128], strides = [1, 1]} : vector<64x128xf32> to vector<8x128xf32>
    %c0_81 = arith.constant 0 : index
    %c896 = arith.constant 896 : index
    %241 = vector.load %arg6[%c0_81, %c896] : memref<8x1024xf32, #tpu.memory_space<vmem>>, vector<8x128xf32>
    tpu.vector_store %arg6[%c0_81, %c896], %240 {strides = array<i32>} : memref<8x1024xf32, #tpu.memory_space<vmem>>, vector<8x128xf32>,
    return
  }
}

</mosaic_0001>

<bundles_post_ra>
// kernel: _forward.1
= control target key start
LH: loop header
LB: loop body
LE: loop exit
PB: predicated region body
PF: predicated region fallthrough
CT: control target
= control target key end

     0   :  { %13 = vsyncpa [#allocation5], 0  ;;  %s3254_s0 = inlined_call_operand.vmem [shape: s32[64,1], index: 0, kind: input, shape index: {}]   ;;  %s3255_s1 = inlined_call_operand.vmem [shape: f32[8,64], index: 1, kind: input, shape index: {}]   ;;  %s3256_s2 = inlined_call_operand.hbm [shape: bf16[128,384], index: 2, kind: input, shape index: {}]   ;;  %s3257_s3 = inlined_call_operand.vmem [shape: bf16[64,384], index: 3, kind: input, shape index: {}]   ;;  %s3258_s4 = inlined_call_operand.hbm [shape: bf16[64,128], index: 4, kind: input, shape index: {}]   ;;  %s3259_s5 = inlined_call_operand.vmem [shape: f32[1,128], index: 5, kind: input, shape index: {}]   ;;  %s3260_s6 = inlined_call_operand.vmem [shape: f32[8,1024], index: 6, kind: output, shape index: {0}]   ;;  %s3261_s7 = inlined_call_operand.vmem [shape: f32[8,64], index: 7, kind: output, shape index: {1}]  }
   0x1   :  { %14 = vsyncpa [#allocation7], 0  ;;  %s2719_s24 = smov [#allocation4]   ;;  %s2671_s28 = scalar_lea.hbm %s3256_s2, 3072 }
   0x2   :  { %s24_s25 = sshll.u32 %s2719_s24, 4  ;;  %p2672_p0 = scmp.ne.s32.totalorder %s3256_s2, %s2671_s28  ;;  %s25_s25 = int_to_ptr.vmem [resolvable:$true] %s24_s25 }
   0x3   :  { %p2675_p1 = scmp.lt.u32.totalorder %s2671_s28, %s3256_s2 }
   0x5   :  { %p2677_p2 = pnand %p2675_p1, %p2672_p0 }
   0x7   :  { %2680 = shalt.err (!%p2677_p2)
}
   0x8   :  { %s2681_s10 = scalar_lea.vmem %s25_s25, 3072  ;;  %p2686_p4 = scmp.lt.s32.totalorder %s25_s25, %s25_s25 }
   0x9   :  { %p2682_p3 = scmp.ne.s32.totalorder %s25_s25, %s2681_s10  ;;  %p2687_p5 = scmp.lt.s32.totalorder %s2681_s10, %s2681_s10 }
   0xb   :  { %p2688_p6 = por %p2687_p5, %p2686_p4 }
   0xd   :  { %p2689_p7 = pnand %p2688_p6, %p2682_p3 }
   0xf   :  { %2692 = shalt.err (!%p2689_p7)
}
  0x10   :  { %s2720_s11 = smov 192   ;;  %s2721_s12 = smov 12  }
  0x11   :  { %30 = dma.hbm_to_vmem [thread:$0]  %s3256_s2, 3072, %s25_s25, [#allocation5], %s2720_s11, %s2720_s11, %s2721_s12  }
  0x12   :  { %s2722_s15 = smov [#allocation6]   ;;  %s2693_s19 = scalar_lea.hbm %s3258_s4, 512 }
  0x13   :  { %s38_s16 = sshll.u32 %s2722_s15, 4  ;;  %p2694_p8 = scmp.ne.s32.totalorder %s3258_s4, %s2693_s19  ;;  %s39_s16 = int_to_ptr.vmem [resolvable:$true] %s38_s16 }
  0x14   :  { %p2697_p9 = scmp.lt.u32.totalorder %s2693_s19, %s3258_s4 }
  0x16   :  { %p2699_p10 = pnand %p2697_p9, %p2694_p8 }
  0x18   :  { %2702 = shalt.err (!%p2699_p10)
}
  0x19   :  { %s2703_s24 = scalar_lea.vmem %s39_s16, 512  ;;  %p2708_p12 = scmp.lt.s32.totalorder %s39_s16, %s39_s16 }
  0x1a   :  { %p2704_p11 = scmp.ne.s32.totalorder %s39_s16, %s2703_s24  ;;  %p2709_p13 = scmp.lt.s32.totalorder %s2703_s24, %s2703_s24 }
  0x1c   :  { %p2710_p0 = por %p2709_p13, %p2708_p12 }
  0x1e   :  { %p2711_p1 = pnand %p2710_p0, %p2704_p11 }
  0x20   :  { %2714 = shalt.err (!%p2711_p1)
}
  0x21   :  { %s2723_s2 = smov 64   ;;  %s2724_s25 = smov 4  }
  0x22   :  { %44 = dma.hbm_to_vmem [thread:$0]  %s3258_s4, 512, %s39_s16, [#allocation7], %s2723_s2, %s2723_s2, %s2724_s25  }
  0x23   :  { %2715 = dma.done.wait [#allocation5], 3072  }
  0x24   :  { %2716 = vsyncadd [#allocation5], 4294964224 }
  0x25   :  { %2717 = dma.done.wait [#allocation7], 512  }
  0x26   :  { %2718 = vsyncadd [#allocation7], 4294966784  ;;  %v2725_v0 = vmov 0   ;;  %v58_v1 = vld [vmem:[%s3254_s0 + $0x10] sm:$0xff]  ;;  %v56_v2 = vld [vmem:[%s3254_s0] sm:$0xff]  ;;  %v2726_v34 = vmov 0.0   ;;  %v54_v35 = vlaneseq }
  0x27   :  { %2498 = vset.pattern.permute.xlu1 %v2725_v0  ;;  %2497 = vset.pattern.permute.xlu0 %v2725_v0  ;;  %v59_v3 = vld [vmem:[%s3254_s0 + $0x18] sm:$0xff]  ;;  %v57_v4 = vld [vmem:[%s3254_s0 + $0x8] sm:$0xff]  ;;  %v2499_v5 = vld [vmem:[#allocation4 + $0x4] ss:$12 sps:$4 sm:$0xff]   ;;  %v2727_v45 = vmov 1.0|1.0  }
  0x28   :  { %308 = vmatprep.mubr.bf16.mxu0 %v2725_v0  ;;  %71 = vperm.xlu1 %2498, %v58_v1   ;;  %v61_v6 = vld [vmem:[%s3254_s0 + $0x28] sm:$0xff]  ;;  %v60_v7 = vld [vmem:[%s3254_s0 + $0x20] sm:$0xff]  ;;  %v63_v14 = vld [vmem:[%s3254_s0 + $0x38] sm:$0xff]  ;;  %v55_v38 = vand.u32 127, %v54_v35  ;;  %vm523_vm12 = vcmask 523264   ;;  %vm2728_vm13 = vmmov 0  }
  0x29   :  { %65 = vperm.xlu0 %2497, %v56_v2   ;;  %v2501_v8 = vld [vmem:[#allocation4 + $0x8] ss:$12 sps:$4 sm:$0xff]   ;;  %v2502_v9 = vld [vmem:[#allocation4] ss:$12 sps:$4 sm:$0xff]   ;;  %276 = vmatprep.subr.bf16.mxu0 %v2499_v5  ;;  %v2506_v12 = vld [vmem:[#allocation4 + $0x18] ss:$12 sps:$4 sm:$0xff]  }
  0x2a   :  { %v2503_v10 = vld [vmem:[#allocation4 + $0x1c] ss:$12 sps:$4 sm:$0xff]   ;;  %2351 = vmatprep.subr.bf16.mxu1 %v2501_v8  ;;  %v2505_v11 = vld [vmem:[#allocation4 + $0x20] ss:$12 sps:$4 sm:$0xff]   ;;  %277 = vmatpush1.bf16.msra.mxu0 %v2502_v9  ;;  %v2509_v15 = vld [vmem:[#allocation4 + $0x38] ss:$12 sps:$4 sm:$0xff]  }
  0x2b   :  { %2352 = vmatpush3.bf16.msra.mxu1 %v2501_v8  ;;  %278 = vmatprep.subr.bf16.mxu0 %v2503_v10  ;;  %v2507_v13 = vld [vmem:[#allocation4 + $0x34] ss:$12 sps:$4 sm:$0xff]   ;;  %v2510_v17 = vld [vmem:[#allocation4 + $0x30] ss:$12 sps:$4 sm:$0xff]   ;;  %v2511_v18 = vld [vmem:[#allocation4 + $0x4c] ss:$12 sps:$4 sm:$0xff]  }
  0x2c   :  { %74 = vperm.xlu1 %2498, %v59_v3   ;;  %2353 = vmatprep.subr.bf16.mxu1 %v2505_v11  ;;  %v62_v16 = vld [vmem:[%s3254_s0 + $0x30] sm:$0xff]  ;;  %v2518_v23 = vld [vmem:[#allocation4 + $0x60] ss:$12 sps:$4 sm:$0xff]   ;;  %v2519_v24 = vld [vmem:[#allocation4 + $0x7c] ss:$12 sps:$4 sm:$0xff]   ;;  %vm629_vm14 = vcmask 519168  }
  0x2d   :  { %68 = vperm.xlu0 %2497, %v57_v4   ;;  %v2513_v19 = vld [vmem:[#allocation4 + $0x50] ss:$12 sps:$4 sm:$0xff]   ;;  %v2514_v20 = vld [vmem:[#allocation4 + $0x48] ss:$12 sps:$4 sm:$0xff]   ;;  %v2521_v25 = vld [vmem:[#allocation4 + $0x80] ss:$12 sps:$4 sm:$0xff]  }
  0x2e   :  { %279 = vmatpush1.bf16.msra.mxu0 %v2506_v12  ;;  %v2515_v21 = vld [vmem:[#allocation4 + $0x64] ss:$12 sps:$4 sm:$0xff]   ;;  %v2517_v22 = vld [vmem:[#allocation4 + $0x68] ss:$12 sps:$4 sm:$0xff]   ;;  %v2527_v30 = vld [vmem:[#allocation4 + $0xac] ss:$12 sps:$4 sm:$0xff]  }
  0x2f   :  { %2354 = vmatpush3.bf16.msra.mxu1 %v2505_v11  ;;  %280 = vmatprep.subr.bf16.mxu0 %v2507_v13  ;;  %v2522_v26 = vld [vmem:[#allocation4 + $0x78] ss:$12 sps:$4 sm:$0xff]   ;;  %v2523_v27 = vld [vmem:[#allocation4 + $0x94] ss:$12 sps:$4 sm:$0xff]   ;;  %v2526_v29 = vld [vmem:[#allocation4 + $0x90] ss:$12 sps:$4 sm:$0xff]  }
  0x30   :  { %80 = vperm.xlu1 %2498, %v61_v6   ;;  %2355 = vmatprep.subr.bf16.mxu1 %v2509_v15  ;;  %v2525_v28 = vld [vmem:[#allocation4 + $0x98] ss:$12 sps:$4 sm:$0xff]   ;;  %v2529_v31 = vld [vmem:[#allocation4 + $0xb0] ss:$12 sps:$4 sm:$0xff]   ;;  %v2530_v32 = vld [vmem:[#allocation4 + $0xa8] ss:$12 sps:$4 sm:$0xff]  }
  0x31   :  { %77 = vperm.xlu0 %2497, %v60_v7   ;;  %v2823_v33 = vld [vmem:[%s3257_s3 + $0x4] ss:$12 sps:$4 sm:$0xff]   ;;  %v2834_v42 = vld [vmem:[%s3257_s3] ss:$12 sps:$4 sm:$0xff]   ;;  %v2543_v43 = vld [vmem:[%s3257_s3 + $0x8] ss:$12 sps:$4 sm:$0xff]  }
  0x32   :  { %281 = vmatpush1.bf16.msra.mxu0 %v2510_v17  ;;  %v2842_v44 = vld [vmem:[%s3257_s3 + $0x1c] ss:$12 sps:$4 sm:$0xff]   ;;  %v2855_v49 = vld [vmem:[%s3257_s3 + $0x18] ss:$12 sps:$4 sm:$0xff]   ;;  %v2544_v50 = vld [vmem:[%s3257_s3 + $0x20] ss:$12 sps:$4 sm:$0xff]  }
  0x33   :  { %2356 = vmatpush3.bf16.msra.mxu1 %v2509_v15  ;;  %282 = vmatprep.subr.bf16.mxu0 %v2511_v18  ;;  %v2866_v51 = vld [vmem:[%s3257_s3 + $0x34] ss:$12 sps:$4 sm:$0xff]   ;;  %v2877_v55 = vld [vmem:[%s3257_s3 + $0x30] ss:$12 sps:$4 sm:$0xff]   ;;  %v2883_v56 = vld [vmem:[%s3257_s3 + $0x4c] ss:$12 sps:$4 sm:$0xff]  }
  0x34   :  { %86 = vperm.xlu1 %2498, %v63_v14   ;;  %2357 = vmatprep.subr.bf16.mxu1 %v2513_v19  ;;  %v2545_v57 = vld [vmem:[%s3257_s3 + $0x38] ss:$12 sps:$4 sm:$0xff]   ;;  %v2898_v58 = vld [vmem:[%s3257_s3 + $0x48] ss:$12 sps:$4 sm:$0xff]   ;;  %v2546_v60 = vld [vmem:[%s3257_s3 + $0x50] ss:$12 sps:$4 sm:$0xff]  }
  0x35   :  { %83 = vperm.xlu0 %2497, %v62_v16   ;;  %v2904_v59 = vld [vmem:[%s3255_s1] sm:$0xff]  ;;  %v2547_v62 = vld [vmem:[%s3257_s3 + $0x8] ss:$12 sps:$4 sm:$0xff]   ;;  %v2550_v2 = vld [vmem:[%s3257_s3 + $0x50] ss:$12 sps:$4 sm:$0xff]   ;;  %vm822_vm15 = vcmask 523268  }
  0x36   :  { %283 = vmatpush1.bf16.msra.mxu0 %v2514_v20  ;;  %v442_v61 = vpack.c.bf16 %v2904_v59, %v2904_v59  ;;  %v2548_v63 = vld [vmem:[%s3257_s3 + $0x20] ss:$12 sps:$4 sm:$0xff]   ;;  %v2549_v1 = vld [vmem:[%s3257_s3 + $0x38] ss:$12 sps:$4 sm:$0xff]  }
  0x37   :  { %2358 = vmatpush3.bf16.msra.mxu1 %v2513_v19  ;;  %284 = vmatprep.subr.bf16.mxu0 %v2515_v21 }
  0x38   :  { %2359 = vmatprep.subr.bf16.mxu1 %v2517_v22 }
  0x3a   :  { %285 = vmatpush1.bf16.msra.mxu0 %v2518_v23 }
  0x3b   :  { %2360 = vmatpush3.bf16.msra.mxu1 %v2517_v22  ;;  %286 = vmatprep.subr.bf16.mxu0 %v2519_v24 }
  0x3c   :  { %2361 = vmatprep.subr.bf16.mxu1 %v2521_v25 }
  0x3e   :  { %287 = vmatpush1.bf16.msra.mxu0 %v2522_v26 }
  0x3f   :  { %2362 = vmatpush3.bf16.msra.mxu1 %v2521_v25  ;;  %288 = vmatprep.subr.bf16.mxu0 %v2523_v27 }
  0x40   :  { %2363 = vmatprep.subr.bf16.mxu1 %v2525_v28 }
  0x42   :  { %289 = vmatpush1.bf16.msra.mxu0 %v2526_v29 }
  0x43   :  { %2364 = vmatpush3.bf16.msra.mxu1 %v2525_v28  ;;  %290 = vmatprep.subr.bf16.mxu0 %v2527_v30 }
  0x44   :  { %2365 = vmatprep.subr.bf16.mxu1 %v2529_v31 }
  0x46   :  { %291 = vmatpush1.bf16.msra.mxu0 %v2530_v32 }
  0x47   :  { %2366 = vmatpush3.bf16.msra.mxu1 %v2529_v31  ;;  %2375 = vmatprep.subr.bf16.mxu0 %v2726_v34 }
  0x48   :  { %527 = vmatprep.subr.bf16.mxu1 %v2823_v33 }
  0xa7   :  { %v72_v36 = vpop.permute.xlu1 %71 }
  0xa8   :  { %v66_v37 = vpop.permute.xlu0 %65  ;;  %vm90_vm0 = vcmp.eq.s32.totalorder %v55_v38, %v72_v36 }
  0xa9   :  { %vm88_vm3 = vcmp.eq.s32.totalorder %v55_v38, %v66_v37 }
  0xab   :  { %v75_v39 = vpop.permute.xlu1 %74 }
  0xac   :  { %v69_v40 = vpop.permute.xlu0 %68  ;;  %vm91_vm1 = vcmp.eq.s32.totalorder %v55_v38, %v75_v39 }
  0xad   :  { %vm89_vm2 = vcmp.eq.s32.totalorder %v55_v38, %v69_v40  ;;  %vm2827_vm4 = vmpackc.low %vm91_vm1, %vm90_vm0 }
  0xae   :  { %vm2138_vm5 = vmpackc.low %vm89_vm2, %vm88_vm3 }
  0xaf   :  { %2139 = vmatmul.mubr.msk.bf16.vlgmr.msra.gmra.mrb[0].mxu0 %vm2138_vm5, %v2727_v45  ;;  %2367 = vmatprep.mubr.msk.bf16.mxu1 %vm2138_vm5, %v2727_v45  ;;  %v81_v46 = vpop.permute.xlu1 %80 }
  0xb0   :  { %v78_v47 = vpop.permute.xlu0 %77  ;;  %vm93_vm6 = vcmp.eq.s32.totalorder %v55_v38, %v81_v46  ;;  %2368 = vmatmul.mubr.msk.bf16.vlgmr.msra.gmra.mrb[0].mxu1 %vm2827_vm4, %v2727_v45  ;;  %318 = vmatprep.mubr.bf16.mxu0 %v2725_v0 }
  0xb1   :  { %vm92_vm7 = vcmp.eq.s32.totalorder %v55_v38, %v78_v47  ;;  %528 = vmatpush1.bf16.msra.mxu1 %v2834_v42  ;;  %2376 = vmatpush3.bf16.msra.mxu0 %v2543_v43 }
  0xb2   :  { %vm2848_vm8 = vmpackc.low %vm93_vm6, %vm92_vm7  ;;  %529 = vmatprep.subr.bf16.mxu1 %v2842_v44  ;;  %2377 = vmatprep.subr.bf16.mxu0 %v2726_v34 }
  0xb3   :  { %2371 = vmatprep.mubr.msk.bf16.mxu1 %vm2848_vm8, %v2727_v45  ;;  %v87_v52 = vpop.permute.xlu1 %86 }
  0xb4   :  { %v84_v53 = vpop.permute.xlu0 %83  ;;  %vm95_vm9 = vcmp.eq.s32.totalorder %v55_v38, %v87_v52 }
  0xb5   :  { %vm94_vm10 = vcmp.eq.s32.totalorder %v55_v38, %v84_v53  ;;  %530 = vmatpush1.bf16.msra.mxu1 %v2855_v49  ;;  %2378 = vmatpush3.bf16.msra.mxu0 %v2544_v50 }
  0xb6   :  { %vm2870_vm11 = vmpackc.low %vm95_vm9, %vm94_vm10  ;;  %531 = vmatprep.subr.bf16.mxu1 %v2866_v51  ;;  %2379 = vmatprep.subr.bf16.mxu0 %v2726_v34 }
  0xb7   :  { %2141 = vmatmul.mubr.msk.bf16.gmra.mrb[4].mxu0 %vm2827_vm4, %v2727_v45 }
  0xb8   :  { %2372 = vmatmul.mubr.msk.bf16.gmra.mrb[4].mxu1 %vm2870_vm11, %v2727_v45  ;;  %328 = vmatprep.mubr.bf16.mxu0 %v2725_v0 }
  0xb9   :  { %532 = vmatpush1.bf16.msra.mxu1 %v2877_v55  ;;  %559 = vmatprep.mubr.bf16.mxu1 %v2725_v0 }
  0xba   :  { %533 = vmatprep.subr.bf16.mxu1 %v2883_v56  ;;  %2380 = vmatpush3.bf16.msra.mxu0 %v2545_v57 }
  0xbb   :  { %2381 = vmatprep.subr.bf16.mxu0 %v2726_v34 }
  0xbd   :  { %534 = vmatpush1.bf16.msra.mxu1 %v2898_v58 }
  0xbe   :  { %2382 = vmatpush3.bf16.msra.mxu0 %v2546_v60  ;;  %717 = vmatprep.subr.bf16.mxu1 %v2823_v33 }
  0xbf   :  { %2143 = vmatmul.mubr.msk.bf16.gmra.mrb[8].mxu0 %vm2848_vm8, %v2727_v45  ;;  %2387 = vmatprep.subr.bf16.mxu0 %v2726_v34 }
  0xc0   :  { %2166 = vmatmul.mubr.msk.bf16.vlgmr.msra.gmra.mrb[8].mxu1 %vm523_vm12, %v442_v61  ;;  %338 = vmatprep.mubr.bf16.mxu0 %v2725_v0 }
  0xc1   :  { %718 = vmatpush1.bf16.msra.mxu1 %v2834_v42  ;;  %749 = vmatprep.mubr.bf16.mxu1 %v2725_v0 }
  0xc2   :  { %719 = vmatprep.subr.bf16.mxu1 %v2842_v44 }
  0xc5   :  { %720 = vmatpush1.bf16.msra.mxu1 %v2855_v49 }
  0xc6   :  { %721 = vmatprep.subr.bf16.mxu1 %v2866_v51 }
  0xc7   :  { %2145 = vmatmul.mubr.msk.bf16.gmra.mrb[12].mxu0 %vm2870_vm11, %v2727_v45 }
  0xc8   :  { %2383 = vmatprep.mubr.msk.bf16.mxu0 %vm2728_vm13, %v2726_v34 }
  0xc9   :  { %722 = vmatpush1.bf16.msra.mxu1 %v2877_v55 }
  0xca   :  { %723 = vmatprep.subr.bf16.mxu1 %v2883_v56 }
  0xcd   :  { %724 = vmatpush1.bf16.msra.mxu1 %v2898_v58 }
  0xce   :  { %910 = vmatprep.subr.bf16.mxu1 %v2823_v33 }
  0xcf   :  { %2384 = vmatmul.mubr.msk.bf16.vlgmr.msra.gmra.mrb[16].mxu0 %vm523_vm12, %v442_v61 }
  0xd0   :  { %2395 = vmatprep.mubr.msk.bf16.mxu0 %vm2728_vm13, %v2726_v34  ;;  %2388 = vmatpush3.bf16.msra.mxu0 %v2547_v62  ;;  %v2552_v62 = vld [vmem:[%s3257_s3 + $0x20] ss:$12 sps:$4 sm:$0xff]  }
  0xd1   :  { %2389 = vmatprep.subr.bf16.mxu0 %v2726_v34 }
  0xd4   :  { %2390 = vmatpush3.bf16.msra.mxu0 %v2548_v63  ;;  %v2553_v63 = vld [vmem:[%s3257_s3 + $0x38] ss:$12 sps:$4 sm:$0xff]  }
  0xd5   :  { %2391 = vmatprep.subr.bf16.mxu0 %v2726_v34 }
  0xd8   :  { %2392 = vmatpush3.bf16.msra.mxu0 %v2549_v1  ;;  %v2554_v1 = vld [vmem:[%s3257_s3 + $0x50] ss:$12 sps:$4 sm:$0xff]  }
  0xd9   :  { %2393 = vmatprep.subr.bf16.mxu0 %v2726_v34 }
  0xdc   :  { %2394 = vmatpush3.bf16.msra.mxu0 %v2550_v2 }
  0xdd   :  { %2399 = vmatprep.subr.bf16.mxu0 %v2726_v34 }
 0x182   :  { %v310_v3 = vpop.f32.mrb[0].mxu0 }
 0x183   :  { %v312_v4 = vpop.f32.mrb[1].mxu0  ;;  %v2952_v5 = vpop.f32.mrb[0].mxu1 }
 0x184   :  { %v2954_v6 = vpop.f32.mrb[2].mxu0  ;;  %v383_v7 = vpop.f32.mrb[1].mxu1 }
 0x185   :  { %v2956_v8 = vpop.f32.mrb[3].mxu0  ;;  %v2958_v9 = vpop.f32.mrb[2].mxu1 }
 0x186   :  { %v2960_v10 = vpop.f32.mrb[3].mxu1 }
 0x18a   :  { %v2962_v11 = vpop.f32.mrb[4].mxu0 }
 0x18b   :  { %v2964_v12 = vpop.f32.mrb[5].mxu0  ;;  %v2966_v13 = vpop.f32.mrb[4].mxu1 }
 0x18c   :  { %v2968_v14 = vpop.f32.mrb[6].mxu0  ;;  %v2970_v15 = vpop.f32.mrb[5].mxu1 }
 0x18d   :  { %v2972_v16 = vpop.f32.mrb[7].mxu0  ;;  %v2974_v17 = vpop.f32.mrb[6].mxu1 }
 0x18e   :  { %v2976_v18 = vpop.f32.mrb[7].mxu1 }
 0x192   :  { %v2978_v19 = vpop.f32.mrb[8].mxu0 }
 0x193   :  { %v2980_v20 = vpop.f32.mrb[9].mxu0  ;;  %v561_v21 = vpop.f32.mrb[8].mxu1 }
 0x194   :  { %v608_v22 = vadd.f32 %v561_v21, %v310_v3  ;;  %v2982_v23 = vpop.f32.mrb[10].mxu0  ;;  %v563_v24 = vpop.f32.mrb[9].mxu1 }
 0x195   :  { %v609_v25 = vadd.f32 %v563_v24, %v312_v4  ;;  %v2984_v26 = vpop.f32.mrb[11].mxu0  ;;  %v565_v27 = vpop.f32.mrb[10].mxu1 }
 0x196   :  { %v2168_v28 = vmul.f32 -1.442695, %v608_v22  ;;  %v566_v29 = vpop.f32.mrb[11].mxu1 }
 0x197   :  { %v2169_v36 = vmul.f32 -1.442695, %v609_v25 }
 0x198   :  { %2591 = vpow2.f32 %v2168_v28 }
 0x199   :  { %2593 = vpow2.f32 %v2169_v36 }
 0x19a   :  { %v2986_v30 = vpop.f32.mrb[12].mxu0 }
 0x19b   :  { %v2988_v31 = vpop.f32.mrb[13].mxu0 }
 0x19c   :  { %v2990_v32 = vpop.f32.mrb[14].mxu0 }
 0x19d   :  { %v2992_v35 = vpop.f32.mrb[15].mxu0 }
 0x1a2   :  { %v2592_v37 = vpop.eup %2591  ;;  %v602_v38 = vpop.f32.mrb[16].mxu0 }
 0x1a3   :  { %v616_v39 = vadd.f32 1.0, %v2592_v37  ;;  %v2385_v40 = vpop.f32.mrb[17].mxu0  ;;  %v2594_v45 = vpop.eup %2593 }
 0x1a4   :  { %v605_v41 = vpop.f32.mrb[18].mxu0  ;;  %v617_v48 = vadd.f32 1.0, %v2594_v45 }
 0x1a5   :  { %2595 = vrcp.f32 %v616_v39  ;;  %v2386_v43 = vpop.f32.mrb[19].mxu0 }
 0x1af   :  { %v2596_v46 = vpop.eup %2595 }
 0x1b0   :  { %v622_v47 = vmul.f32 %v2596_v46, %v602_v38 }
 0x1b2   :  { %v623_v50 = vadd.f32 %v622_v47, %v383_v7 }
 0x1b4   :  { %2597 = vtanh.f32 %v623_v50 }
 0x1b5   :  { %2599 = vrcp.f32 %v617_v48 }
 0x1be   :  { %v2598_v52 = vpop.eup %2597 }
 0x1bf   :  { %v625_v53 = vsub.f32 %v2904_v59, %v2598_v52  ;;  %v2600_v54 = vpop.eup %2599  ;;  %v2551_v59 = vld [vmem:[%s3257_s3 + $0x8] ss:$12 sps:$4 sm:$0xff]  }
 0x1c1   :  { %v626_v57 = vmul.f32 %v2600_v54, %v625_v53  ;;  %v2556_v53 = vld [vmem:[%s3257_s3 + $0x20] ss:$12 sps:$4 sm:$0xff]   ;;  %v2557_v54 = vld [vmem:[%s3257_s3 + $0x38] ss:$12 sps:$4 sm:$0xff]  }
 0x1c3   :  { %v627_v60 = vadd.f32 %v2598_v52, %v626_v57  ;;  %v2558_v57 = vld [vmem:[%s3257_s3 + $0x50] ss:$12 sps:$4 sm:$0xff]  }
 0x1c5   :  { %v628_v61 = vpack.c.bf16 %v627_v60, %v627_v60 }
 0x1c7   :  { %630 = vst.msk [vmem:[#allocation3] sm:$0xf] %vm629_vm14, %v628_v61  ;;  %2182 = vmatmul.mubr.msk.bf16.vlgmr.msra.gmra.mrb[12].mxu1 %vm523_vm12, %v628_v61  ;;  %2396 = vmatmul.mubr.msk.bf16.vlgmr.msra.gmra.mrb[20].mxu0 %vm523_vm12, %v628_v61 }
 0x1c8   :  { %911 = vmatpush1.bf16.msra.mxu1 %v2834_v42  ;;  %942 = vmatprep.mubr.bf16.mxu1 %v2725_v0 }
 0x1c9   :  { %912 = vmatprep.subr.bf16.mxu1 %v2842_v44  ;;  %2407 = vmatprep.mubr.msk.bf16.mxu0 %vm2728_vm13, %v2726_v34 }
 0x1ca   :  { %2400 = vmatpush3.bf16.msra.mxu0 %v2551_v59 }
 0x1cb   :  { %2401 = vmatprep.subr.bf16.mxu0 %v2726_v34 }
 0x1cc   :  { %913 = vmatpush1.bf16.msra.mxu1 %v2855_v49 }
 0x1cd   :  { %914 = vmatprep.subr.bf16.mxu1 %v2866_v51 }
 0x1ce   :  { %2402 = vmatpush3.bf16.msra.mxu0 %v2552_v62 }
 0x1cf   :  { %2403 = vmatprep.subr.bf16.mxu0 %v2726_v34 }
 0x1d0   :  { %915 = vmatpush1.bf16.msra.mxu1 %v2877_v55 }
 0x1d1   :  { %916 = vmatprep.subr.bf16.mxu1 %v2883_v56 }
 0x1d2   :  { %2404 = vmatpush3.bf16.msra.mxu0 %v2553_v63 }
 0x1d3   :  { %2405 = vmatprep.subr.bf16.mxu0 %v2726_v34 }
 0x1d4   :  { %917 = vmatpush1.bf16.msra.mxu1 %v2898_v58 }
 0x1d5   :  { %1099 = vmatprep.subr.bf16.mxu1 %v2823_v33 }
 0x1d6   :  { %2406 = vmatpush3.bf16.msra.mxu0 %v2554_v1 }
 0x1d7   :  { %2411 = vmatprep.subr.bf16.mxu0 %v2726_v34 }
 0x29a   :  { %v751_v2 = vpop.f32.mrb[12].mxu1  ;;  %v792_v3 = vpop.f32.mrb[20].mxu0 }
 0x29b   :  { %v798_v4 = vadd.f32 %v751_v2, %v2954_v6  ;;  %v753_v7 = vpop.f32.mrb[13].mxu1  ;;  %v2397_v21 = vpop.f32.mrb[21].mxu0 }
 0x29c   :  { %v799_v22 = vadd.f32 %v753_v7, %v2956_v8  ;;  %v755_v24 = vpop.f32.mrb[14].mxu1  ;;  %v795_v25 = vpop.f32.mrb[22].mxu0 }
 0x29d   :  { %v2184_v27 = vmul.f32 -1.442695, %v798_v4  ;;  %v756_v28 = vpop.f32.mrb[15].mxu1  ;;  %v2398_v29 = vpop.f32.mrb[23].mxu0 }
 0x29e   :  { %v2185_v36 = vmul.f32 -1.442695, %v799_v22 }
 0x29f   :  { %2601 = vpow2.f32 %v2184_v27 }
 0x2a0   :  { %2603 = vpow2.f32 %v2185_v36 }
 0x2a9   :  { %v2602_v37 = vpop.eup %2601 }
 0x2aa   :  { %v806_v38 = vadd.f32 1.0, %v2602_v37  ;;  %v2604_v39 = vpop.eup %2603 }
 0x2ab   :  { %v807_v43 = vadd.f32 1.0, %v2604_v39 }
 0x2ac   :  { %2605 = vrcp.f32 %v806_v38 }
 0x2b6   :  { %v2606_v40 = vpop.eup %2605 }
 0x2b7   :  { %v812_v41 = vmul.f32 %v2606_v40, %v792_v3 }
 0x2b9   :  { %v813_v6 = vadd.f32 %v812_v41, %v2960_v10  ;;  %v2555_v10 = vld [vmem:[%s3257_s3 + $0x8] ss:$12 sps:$4 sm:$0xff]  }
 0x2bb   :  { %2607 = vtanh.f32 %v813_v6  ;;  %v2560_v6 = vld [vmem:[%s3257_s3 + $0x20] ss:$12 sps:$4 sm:$0xff]  }
 0x2bc   :  { %2609 = vrcp.f32 %v807_v43  ;;  %v2561_v43 = vld [vmem:[%s3257_s3 + $0x38] ss:$12 sps:$4 sm:$0xff]  }
 0x2c5   :  { %v2608_v8 = vpop.eup %2607 }
 0x2c6   :  { %v815_v45 = vsub.f32 %v627_v60, %v2608_v8  ;;  %v2610_v46 = vpop.eup %2609 }
 0x2c8   :  { %v816_v47 = vmul.f32 %v2610_v46, %v815_v45 }
 0x2ca   :  { %v817_v48 = vadd.f32 %v2608_v8, %v816_v47  ;;  %v2562_v8 = vld [vmem:[%s3257_s3 + $0x50] ss:$12 sps:$4 sm:$0xff]  }
 0x2cc   :  { %v818_v50 = vpack.c.bf16 %v817_v48, %v817_v48 }
 0x2ce   :  { %v820_v52 = vrot.slane %v818_v50, 4  ;;  %2198 = vmatmul.mubr.msk.bf16.vlgmr.msra.gmra.mrb[16].mxu1 %vm523_vm12, %v818_v50  ;;  %2408 = vmatmul.mubr.msk.bf16.vlgmr.msra.gmra.mrb[24].mxu0 %vm523_vm12, %v818_v50 }
 0x2cf   :  { %1100 = vmatpush1.bf16.msra.mxu1 %v2834_v42  ;;  %1131 = vmatprep.mubr.bf16.mxu1 %v2725_v0 }
 0x2d0   :  { %823 = vst.msk [vmem:[#allocation3] sm:$0xf0] %vm822_vm15, %v820_v52  ;;  %1101 = vmatprep.subr.bf16.mxu1 %v2842_v44  ;;  %2419 = vmatprep.mubr.msk.bf16.mxu0 %vm2728_vm13, %v2726_v34 }
 0x2d1   :  { %2412 = vmatpush3.bf16.msra.mxu0 %v2555_v10 }
 0x2d2   :  { %2413 = vmatprep.subr.bf16.mxu0 %v2726_v34 }
 0x2d3   :  { %1102 = vmatpush1.bf16.msra.mxu1 %v2855_v49 }
 0x2d4   :  { %1103 = vmatprep.subr.bf16.mxu1 %v2866_v51 }
 0x2d5   :  { %2414 = vmatpush3.bf16.msra.mxu0 %v2556_v53 }
 0x2d6   :  { %2415 = vmatprep.subr.bf16.mxu0 %v2726_v34 }
 0x2d7   :  { %1104 = vmatpush1.bf16.msra.mxu1 %v2877_v55 }
 0x2d8   :  { %1105 = vmatprep.subr.bf16.mxu1 %v2883_v56 }
 0x2d9   :  { %2416 = vmatpush3.bf16.msra.mxu0 %v2557_v54 }
 0x2da   :  { %2417 = vmatprep.subr.bf16.mxu0 %v2726_v34 }
 0x2db   :  { %1106 = vmatpush1.bf16.msra.mxu1 %v2898_v58 }
 0x2dc   :  { %1291 = vmatprep.subr.bf16.mxu1 %v2823_v33 }
 0x2dd   :  { %2418 = vmatpush3.bf16.msra.mxu0 %v2558_v57 }
 0x2de   :  { %2423 = vmatprep.subr.bf16.mxu0 %v2726_v34 }
 0x3a1   :  { %v944_v60 = vpop.f32.mrb[16].mxu1  ;;  %v985_v61 = vpop.f32.mrb[24].mxu0 }
 0x3a2   :  { %v991_v59 = vadd.f32 %v944_v60, %v2962_v11  ;;  %v946_v62 = vpop.f32.mrb[17].mxu1  ;;  %v2409_v63 = vpop.f32.mrb[25].mxu0 }
 0x3a3   :  { %v992_v1 = vadd.f32 %v946_v62, %v2964_v12  ;;  %v948_v2 = vpop.f32.mrb[18].mxu1  ;;  %v988_v3 = vpop.f32.mrb[26].mxu0 }
 0x3a4   :  { %v2200_v4 = vmul.f32 -1.442695, %v991_v59  ;;  %v949_v7 = vpop.f32.mrb[19].mxu1  ;;  %v2410_v21 = vpop.f32.mrb[27].mxu0 }
 0x3a5   :  { %v2201_v22 = vmul.f32 -1.442695, %v992_v1 }
 0x3a6   :  { %2611 = vpow2.f32 %v2200_v4 }
 0x3a7   :  { %2613 = vpow2.f32 %v2201_v22 }
 0x3b0   :  { %v2612_v24 = vpop.eup %2611 }
 0x3b1   :  { %v999_v25 = vadd.f32 1.0, %v2612_v24  ;;  %v2614_v27 = vpop.eup %2613 }
 0x3b2   :  { %v1000_v36 = vadd.f32 1.0, %v2614_v27  ;;  %v2564_v27 = vld [vmem:[%s3257_s3 + $0x20] ss:$12 sps:$4 sm:$0xff]  }
 0x3b3   :  { %2615 = vrcp.f32 %v999_v25 }
 0x3bd   :  { %v2616_v28 = vpop.eup %2615 }
 0x3be   :  { %v1005_v29 = vmul.f32 %v2616_v28, %v985_v61  ;;  %v2565_v28 = vld [vmem:[%s3257_s3 + $0x38] ss:$12 sps:$4 sm:$0xff]  }
 0x3c0   :  { %v1006_v11 = vadd.f32 %v2952_v5, %v1005_v29  ;;  %v2559_v5 = vld [vmem:[%s3257_s3 + $0x8] ss:$12 sps:$4 sm:$0xff]  }
 0x3c2   :  { %2617 = vtanh.f32 %v1006_v11 }
 0x3c3   :  { %2619 = vrcp.f32 %v1000_v36 }
 0x3cc   :  { %v2618_v12 = vpop.eup %2617 }
 0x3cd   :  { %v1008_v37 = vsub.f32 %v817_v48, %v2618_v12  ;;  %v2620_v38 = vpop.eup %2619 }
 0x3cf   :  { %v1009_v39 = vmul.f32 %v2620_v38, %v1008_v37 }
 0x3d1   :  { %v1010_v40 = vadd.f32 %v2618_v12, %v1009_v39 }
 0x3d3   :  { %v1011_v41 = vpack.c.bf16 %v1010_v40, %v1010_v40 }
 0x3d5   :  { %1012 = vst.msk [vmem:[#allocation3 + $0x8] sm:$0xf] %vm629_vm14, %v1011_v41  ;;  %2214 = vmatmul.mubr.msk.bf16.vlgmr.msra.gmra.mrb[20].mxu1 %vm523_vm12, %v1011_v41  ;;  %2420 = vmatmul.mubr.msk.bf16.vlgmr.msra.gmra.mrb[28].mxu0 %vm523_vm12, %v1011_v41 }
 0x3d6   :  { %1292 = vmatpush1.bf16.msra.mxu1 %v2834_v42  ;;  %1323 = vmatprep.mubr.bf16.mxu1 %v2725_v0 }
 0x3d7   :  { %1293 = vmatprep.subr.bf16.mxu1 %v2842_v44  ;;  %2431 = vmatprep.mubr.msk.bf16.mxu0 %vm2728_vm13, %v2726_v34 }
 0x3d8   :  { %2424 = vmatpush3.bf16.msra.mxu0 %v2559_v5 }
 0x3d9   :  { %2425 = vmatprep.subr.bf16.mxu0 %v2726_v34 }
 0x3da   :  { %1294 = vmatpush1.bf16.msra.mxu1 %v2855_v49 }
 0x3db   :  { %1295 = vmatprep.subr.bf16.mxu1 %v2866_v51 }
 0x3dc   :  { %2426 = vmatpush3.bf16.msra.mxu0 %v2560_v6 }
 0x3dd   :  { %2427 = vmatprep.subr.bf16.mxu0 %v2726_v34 }
 0x3de   :  { %1296 = vmatpush1.bf16.msra.mxu1 %v2877_v55 }
 0x3df   :  { %1297 = vmatprep.subr.bf16.mxu1 %v2883_v56 }
 0x3e0   :  { %2428 = vmatpush3.bf16.msra.mxu0 %v2561_v43 }
 0x3e1   :  { %2429 = vmatprep.subr.bf16.mxu0 %v2726_v34 }
 0x3e2   :  { %1298 = vmatpush1.bf16.msra.mxu1 %v2898_v58 }
 0x3e3   :  { %1480 = vmatprep.subr.bf16.mxu1 %v2823_v33 }
 0x3e4   :  { %2430 = vmatpush3.bf16.msra.mxu0 %v2562_v8 }
 0x3e5   :  { %2435 = vmatprep.subr.bf16.mxu0 %v2726_v34 }
 0x4a8   :  { %v1133_v45 = vpop.f32.mrb[20].mxu1  ;;  %v1174_v46 = vpop.f32.mrb[28].mxu0 }
 0x4a9   :  { %v1180_v47 = vadd.f32 %v1133_v45, %v2968_v14  ;;  %v1135_v48 = vpop.f32.mrb[21].mxu1  ;;  %v2421_v50 = vpop.f32.mrb[29].mxu0 }
 0x4aa   :  { %v1181_v52 = vadd.f32 %v1135_v48, %v2972_v16  ;;  %v1137_v10 = vpop.f32.mrb[22].mxu1  ;;  %v1177_v53 = vpop.f32.mrb[30].mxu0 }
 0x4ab   :  { %v2216_v54 = vmul.f32 -1.442695, %v1180_v47  ;;  %v1138_v57 = vpop.f32.mrb[23].mxu1  ;;  %v2422_v60 = vpop.f32.mrb[31].mxu0 }
 0x4ac   :  { %v2217_v61 = vmul.f32 -1.442695, %v1181_v52 }
 0x4ad   :  { %2621 = vpow2.f32 %v2216_v54 }
 0x4ae   :  { %2623 = vpow2.f32 %v2217_v61 }
 0x4b7   :  { %v2622_v59 = vpop.eup %2621 }
 0x4b8   :  { %v1188_v62 = vadd.f32 1.0, %v2622_v59  ;;  %v2624_v63 = vpop.eup %2623 }
 0x4b9   :  { %v1189_v3 = vadd.f32 1.0, %v2624_v63 }
 0x4ba   :  { %2625 = vrcp.f32 %v1188_v62 }
 0x4c4   :  { %v2626_v1 = vpop.eup %2625 }
 0x4c5   :  { %v1194_v2 = vmul.f32 %v2626_v1, %v1174_v46 }
 0x4c7   :  { %v1195_v14 = vadd.f32 %v2958_v9, %v1194_v2  ;;  %v2563_v9 = vld [vmem:[%s3257_s3 + $0x8] ss:$12 sps:$4 sm:$0xff]  }
 0x4c9   :  { %2627 = vtanh.f32 %v1195_v14 }
 0x4ca   :  { %2629 = vrcp.f32 %v1189_v3 }
 0x4d3   :  { %v2628_v16 = vpop.eup %2627 }
 0x4d4   :  { %v1197_v4 = vsub.f32 %v1010_v40, %v2628_v16  ;;  %v2630_v7 = vpop.eup %2629 }
 0x4d6   :  { %v1198_v21 = vmul.f32 %v2630_v7, %v1197_v4 }
 0x4d8   :  { %v1199_v22 = vadd.f32 %v2628_v16, %v1198_v21 }
 0x4da   :  { %v1200_v24 = vpack.c.bf16 %v1199_v22, %v1199_v22 }
 0x4dc   :  { %v1202_v25 = vrot.slane %v1200_v24, 4  ;;  %2230 = vmatmul.mubr.msk.bf16.vlgmr.msra.gmra.mrb[24].mxu1 %vm523_vm12, %v1200_v24  ;;  %2432 = vmatmul.mubr.msk.bf16.vlgmr.msra.gmra.mrb[32].mxu0 %vm523_vm12, %v1200_v24 }
 0x4dd   :  { %1481 = vmatpush1.bf16.msra.mxu1 %v2834_v42  ;;  %1512 = vmatprep.mubr.bf16.mxu1 %v2725_v0 }
 0x4de   :  { %1204 = vst.msk [vmem:[#allocation3 + $0x8] sm:$0xf0] %vm822_vm15, %v1202_v25  ;;  %1482 = vmatprep.subr.bf16.mxu1 %v2842_v44  ;;  %2443 = vmatprep.mubr.msk.bf16.mxu0 %vm2728_vm13, %v2726_v34 }
 0x4df   :  { %2436 = vmatpush3.bf16.msra.mxu0 %v2563_v9 }
 0x4e0   :  { %2437 = vmatprep.subr.bf16.mxu0 %v2726_v34 }
 0x4e1   :  { %1483 = vmatpush1.bf16.msra.mxu1 %v2855_v49 }
 0x4e2   :  { %1484 = vmatprep.subr.bf16.mxu1 %v2866_v51 }
 0x4e3   :  { %2438 = vmatpush3.bf16.msra.mxu0 %v2564_v27 }
 0x4e4   :  { %2439 = vmatprep.subr.bf16.mxu0 %v2726_v34 }
 0x4e5   :  { %1485 = vmatpush1.bf16.msra.mxu1 %v2877_v55 }
 0x4e6   :  { %1486 = vmatprep.subr.bf16.mxu1 %v2883_v56 }
 0x4e7   :  { %2440 = vmatpush3.bf16.msra.mxu0 %v2565_v28 }
 0x4e8   :  { %2441 = vmatprep.subr.bf16.mxu0 %v2726_v34 }
 0x4e9   :  { %1487 = vmatpush1.bf16.msra.mxu1 %v2898_v58 }
 0x4ea   :  { %1672 = vmatprep.subr.bf16.mxu1 %v2823_v33  ;;  %v2566_v33 = vld [vmem:[%s3257_s3 + $0x50] ss:$12 sps:$4 sm:$0xff]  }
 0x4eb   :  { %2442 = vmatpush3.bf16.msra.mxu0 %v2566_v33 }
 0x4ec   :  { %2447 = vmatprep.subr.bf16.mxu0 %v2726_v34 }
 0x5af   :  { %v1325_v29 = vpop.f32.mrb[24].mxu1  ;;  %v1366_v11 = vpop.f32.mrb[32].mxu0 }
 0x5b0   :  { %v1372_v36 = vadd.f32 %v1325_v29, %v2978_v19  ;;  %v1327_v12 = vpop.f32.mrb[25].mxu1  ;;  %v2433_v37 = vpop.f32.mrb[33].mxu0  ;;  %v2571_v29 = vld [vmem:[%s3257_s3] ss:$12 sps:$4 sm:$0xff]  }
 0x5b1   :  { %v1373_v38 = vadd.f32 %v1327_v12, %v2980_v20  ;;  %v1329_v39 = vpop.f32.mrb[26].mxu1  ;;  %v1369_v40 = vpop.f32.mrb[34].mxu0  ;;  %v2578_v12 = vld [vmem:[%s3257_s3 + $0x20] ss:$12 sps:$4 sm:$0xff]  }
 0x5b2   :  { %v2232_v41 = vmul.f32 -1.442695, %v1372_v36  ;;  %v1330_v5 = vpop.f32.mrb[27].mxu1  ;;  %v2434_v6 = vpop.f32.mrb[35].mxu0  ;;  %v2575_v36 = vld [vmem:[%s3257_s3 + $0x18] ss:$12 sps:$4 sm:$0xff]  }
 0x5b3   :  { %v2233_v43 = vmul.f32 -1.442695, %v1373_v38  ;;  %v2581_v37 = vld [vmem:[%s3257_s3 + $0x34] ss:$12 sps:$4 sm:$0xff]   ;;  %v2579_v38 = vld [vmem:[%s3257_s3 + $0x30] ss:$12 sps:$4 sm:$0xff]  }
 0x5b4   :  { %2631 = vpow2.f32 %v2232_v41  ;;  %v2582_v39 = vld [vmem:[%s3257_s3 + $0x38] ss:$12 sps:$4 sm:$0xff]   ;;  %v2583_v41 = vld [vmem:[%s3257_s3 + $0x48] ss:$12 sps:$4 sm:$0xff]   ;;  %v2586_v5 = vld [vmem:[%s3257_s3 + $0x50] ss:$12 sps:$4 sm:$0xff]  }
 0x5b5   :  { %2633 = vpow2.f32 %v2233_v43  ;;  %v2585_v40 = vld [vmem:[%s3257_s3 + $0x4c] ss:$12 sps:$4 sm:$0xff]   ;;  %v2587_v6 = vld [vmem:[#allocation6] sm:$0xff]  }
 0x5be   :  { %v2632_v8 = vpop.eup %2631 }
 0x5bf   :  { %v1380_v45 = vadd.f32 1.0, %v2632_v8  ;;  %v2634_v46 = vpop.eup %2633 }
 0x5c0   :  { %v1381_v50 = vadd.f32 1.0, %v2634_v46 }
 0x5c1   :  { %2635 = vrcp.f32 %v1380_v45 }
 0x5cb   :  { %v2636_v47 = vpop.eup %2635 }
 0x5cc   :  { %v1386_v48 = vmul.f32 %v2636_v47, %v1366_v11  ;;  %v2574_v11 = vld [vmem:[%s3257_s3 + $0x8] ss:$12 sps:$4 sm:$0xff]  }
 0x5ce   :  { %v1387_v19 = vadd.f32 %v1386_v48, %v2970_v15 }
 0x5d0   :  { %2637 = vtanh.f32 %v1387_v19 }
 0x5d1   :  { %2639 = vrcp.f32 %v1381_v50 }
 0x5da   :  { %v2638_v20 = vpop.eup %2637 }
 0x5db   :  { %v1389_v52 = vsub.f32 %v1199_v22, %v2638_v20  ;;  %v2640_v10 = vpop.eup %2639 }
 0x5dd   :  { %v1390_v53 = vmul.f32 %v2640_v10, %v1389_v52 }
 0x5df   :  { %v1391_v54 = vadd.f32 %v2638_v20, %v1390_v53 }
 0x5e1   :  { %v1392_v57 = vpack.c.bf16 %v1391_v54, %v1391_v54 }
 0x5e3   :  { %1393 = vst.msk [vmem:[#allocation3 + $0x10] sm:$0xf] %vm629_vm14, %v1392_v57  ;;  %2246 = vmatmul.mubr.msk.bf16.vlgmr.msra.gmra.mrb[28].mxu1 %vm523_vm12, %v1392_v57  ;;  %2444 = vmatmul.mubr.msk.bf16.vlgmr.msra.gmra.mrb[36].mxu0 %vm523_vm12, %v1392_v57 }
 0x5e4   :  { %1673 = vmatpush1.bf16.msra.mxu1 %v2834_v42  ;;  %1704 = vmatprep.mubr.bf16.mxu1 %v2725_v0  ;;  %v2567_v42 = vld [vmem:[%s3257_s3 + $0x8] ss:$12 sps:$4 sm:$0xff]  }
 0x5e5   :  { %1674 = vmatprep.subr.bf16.mxu1 %v2842_v44  ;;  %2455 = vmatprep.mubr.msk.bf16.mxu0 %vm2728_vm13, %v2726_v34  ;;  %v2568_v44 = vld [vmem:[%s3257_s3 + $0x20] ss:$12 sps:$4 sm:$0xff]  }
 0x5e6   :  { %2448 = vmatpush3.bf16.msra.mxu0 %v2567_v42 }
 0x5e7   :  { %2449 = vmatprep.subr.bf16.mxu0 %v2726_v34 }
 0x5e8   :  { %1675 = vmatpush1.bf16.msra.mxu1 %v2855_v49  ;;  %v2569_v49 = vld [vmem:[%s3257_s3 + $0x38] ss:$12 sps:$4 sm:$0xff]  }
 0x5e9   :  { %1676 = vmatprep.subr.bf16.mxu1 %v2866_v51  ;;  %v2570_v51 = vld [vmem:[%s3257_s3 + $0x50] ss:$12 sps:$4 sm:$0xff]  }
 0x5ea   :  { %2450 = vmatpush3.bf16.msra.mxu0 %v2568_v44 }
 0x5eb   :  { %2451 = vmatprep.subr.bf16.mxu0 %v2726_v34 }
 0x5ec   :  { %1677 = vmatpush1.bf16.msra.mxu1 %v2877_v55 }
 0x5ed   :  { %1678 = vmatprep.subr.bf16.mxu1 %v2883_v56 }
 0x5ee   :  { %2452 = vmatpush3.bf16.msra.mxu0 %v2569_v49 }
 0x5ef   :  { %2453 = vmatprep.subr.bf16.mxu0 %v2726_v34 }
 0x5f0   :  { %1679 = vmatpush1.bf16.msra.mxu1 %v2898_v58 }
 0x5f2   :  { %2454 = vmatpush3.bf16.msra.mxu0 %v2570_v51 }
 0x5f3   :  { %2459 = vmatprep.subr.bf16.mxu0 %v2726_v34 }
 0x6b6   :  { %v1514_v55 = vpop.f32.mrb[28].mxu1  ;;  %v1555_v56 = vpop.f32.mrb[36].mxu0 }
 0x6b7   :  { %v1561_v58 = vadd.f32 %v1514_v55, %v2982_v23  ;;  %v1516_v15 = vpop.f32.mrb[29].mxu1  ;;  %v2445_v60 = vpop.f32.mrb[37].mxu0 }
 0x6b8   :  { %v1562_v61 = vadd.f32 %v1516_v15, %v2984_v26  ;;  %v1518_v59 = vpop.f32.mrb[30].mxu1  ;;  %v1558_v62 = vpop.f32.mrb[38].mxu0  ;;  %v2588_v60 = vld [vmem:[#allocation6 + $0x8] sm:$0xff]  }
 0x6b9   :  { %v2248_v63 = vmul.f32 -1.442695, %v1561_v58  ;;  %v1519_v1 = vpop.f32.mrb[31].mxu1  ;;  %v2446_v2 = vpop.f32.mrb[39].mxu0  ;;  %v2590_v59 = vld [vmem:[#allocation6 + $0x18] sm:$0xff]   ;;  %v1969_v62 = vld [vmem:[#allocation3 + $0x8] sm:$0xff] }
 0x6ba   :  { %v2249_v14 = vmul.f32 -1.442695, %v1562_v61  ;;  %v1968_v61 = vld [vmem:[#allocation3] sm:$0xff] }
 0x6bb   :  { %2641 = vpow2.f32 %v2248_v63 }
 0x6bc   :  { %2643 = vpow2.f32 %v2249_v14 }
 0x6c5   :  { %v2642_v3 = vpop.eup %2641 }
 0x6c6   :  { %v1569_v16 = vadd.f32 1.0, %v2642_v3  ;;  %v2644_v4 = vpop.eup %2643 }
 0x6c7   :  { %v1570_v22 = vadd.f32 1.0, %v2644_v4 }
 0x6c8   :  { %2645 = vrcp.f32 %v1569_v16 }
 0x6d2   :  { %v2646_v7 = vpop.eup %2645 }
 0x6d3   :  { %v1575_v21 = vmul.f32 %v2646_v7, %v1555_v56 }
 0x6d5   :  { %v1576_v23 = vadd.f32 %v1575_v21, %v2976_v18  ;;  %v2573_v18 = vld [vmem:[%s3257_s3 + $0x4] ss:$12 sps:$4 sm:$0xff]  }
 0x6d6   :  { %1861 = vmatprep.subr.bf16.mxu1 %v2573_v18 }
 0x6d7   :  { %2647 = vtanh.f32 %v1576_v23 }
 0x6d8   :  { %2649 = vrcp.f32 %v1570_v22 }
 0x6e1   :  { %v2648_v26 = vpop.eup %2647 }
 0x6e2   :  { %v1578_v24 = vsub.f32 %v1391_v54, %v2648_v26  ;;  %v2650_v25 = vpop.eup %2649 }
 0x6e4   :  { %v1579_v9 = vmul.f32 %v2650_v25, %v1578_v24  ;;  %v2282_v25 = vld [vmem:[%s3259_s5] ss:$0 sm:$0xff] }
 0x6e6   :  { %v3159_v27 = vadd.f32 %v2648_v26, %v1579_v9 }
 0x6e8   :  { %v1581_v28 = vpack.c.bf16 %v3159_v27, %v3159_v27 }
 0x6ea   :  { %v1583_v33 = vrot.slane %v1581_v28, 4  ;;  %2262 = vmatmul.mubr.msk.bf16.vlgmr.msra.gmra.mrb[32].mxu1 %vm523_vm12, %v1581_v28  ;;  %2456 = vmatmul.mubr.msk.bf16.vlgmr.msra.gmra.mrb[40].mxu0 %vm523_vm12, %v1581_v28 }
 0x6eb   :  { %1893 = vmatprep.mubr.bf16.mxu1 %v2725_v0  ;;  %2467 = vmatprep.mubr.msk.bf16.mxu0 %vm2728_vm13, %v2726_v34  ;;  %v2577_v0 = vld [vmem:[%s3257_s3 + $0x1c] ss:$12 sps:$4 sm:$0xff]  }
 0x6ec   :  { %1585 = vst.msk [vmem:[#allocation3 + $0x10] sm:$0xf0] %vm822_vm15, %v1583_v33  ;;  %1862 = vmatpush1.bf16.msra.mxu1 %v2571_v29  ;;  %2460 = vmatpush3.bf16.msra.mxu0 %v2574_v11 }
 0x6ed   :  { %2461 = vmatprep.subr.bf16.mxu0 %v2726_v34  ;;  %1863 = vmatprep.subr.bf16.mxu1 %v2577_v0 }
 0x6f0   :  { %1864 = vmatpush1.bf16.msra.mxu1 %v2575_v36  ;;  %2462 = vmatpush3.bf16.msra.mxu0 %v2578_v12 }
 0x6f1   :  { %2463 = vmatprep.subr.bf16.mxu0 %v2726_v34  ;;  %1865 = vmatprep.subr.bf16.mxu1 %v2581_v37 }
 0x6f3   :  { %v1970_v63 = vld [vmem:[#allocation3 + $0x10] sm:$0xff] }
 0x6f4   :  { %1866 = vmatpush1.bf16.msra.mxu1 %v2579_v38  ;;  %2464 = vmatpush3.bf16.msra.mxu0 %v2582_v39 }
 0x6f5   :  { %2465 = vmatprep.subr.bf16.mxu0 %v2726_v34  ;;  %1867 = vmatprep.subr.bf16.mxu1 %v2585_v40 }
 0x6f8   :  { %1868 = vmatpush1.bf16.msra.mxu1 %v2583_v41  ;;  %2466 = vmatpush3.bf16.msra.mxu0 %v2586_v5 }
 0x6f9   :  { %2471 = vmatprep.subr.bf16.mxu1 %v2587_v6 }
 0x7bd   :  { %v1706_v43 = vpop.f32.mrb[32].mxu1  ;;  %v1747_v8 = vpop.f32.mrb[40].mxu0 }
 0x7be   :  { %v1753_v45 = vadd.f32 %v1706_v43, %v2986_v30  ;;  %v1708_v46 = vpop.f32.mrb[33].mxu1  ;;  %v2457_v47 = vpop.f32.mrb[41].mxu0 }
 0x7bf   :  { %v1754_v48 = vadd.f32 %v1708_v46, %v2988_v31  ;;  %v1710_v19 = vpop.f32.mrb[34].mxu1  ;;  %v1750_v50 = vpop.f32.mrb[42].mxu0 }
 0x7c0   :  { %v2264_v34 = vmul.f32 -1.442695, %v1753_v45  ;;  %v1711_v20 = vpop.f32.mrb[35].mxu1  ;;  %v2458_v52 = vpop.f32.mrb[43].mxu0 }
 0x7c1   :  { %v2265_v10 = vmul.f32 -1.442695, %v1754_v48 }
 0x7c2   :  { %2651 = vpow2.f32 %v2264_v34 }
 0x7c3   :  { %2653 = vpow2.f32 %v2265_v10 }
 0x7cc   :  { %v2652_v53 = vpop.eup %2651 }
 0x7cd   :  { %v1761_v54 = vadd.f32 1.0, %v2652_v53  ;;  %v2654_v57 = vpop.eup %2653 }
 0x7ce   :  { %v1762_v49 = vadd.f32 1.0, %v2654_v57 }
 0x7cf   :  { %2655 = vrcp.f32 %v1761_v54 }
 0x7d9   :  { %v2656_v42 = vpop.eup %2655 }
 0x7da   :  { %v1767_v44 = vmul.f32 %v2656_v42, %v1747_v8 }
 0x7dc   :  { %v1768_v30 = vadd.f32 %v2966_v13, %v1767_v44  ;;  %v2589_v13 = vld [vmem:[#allocation6 + $0x10] sm:$0xff]  }
 0x7de   :  { %2657 = vtanh.f32 %v1768_v30 }
 0x7df   :  { %2659 = vrcp.f32 %v1762_v49 }
 0x7e8   :  { %v2658_v31 = vpop.eup %2657 }
 0x7e9   :  { %v1770_v51 = vsub.f32 %v3159_v27, %v2658_v31  ;;  %v2660_v55 = vpop.eup %2659 }
 0x7eb   :  { %v1771_v56 = vmul.f32 %v2660_v55, %v1770_v51 }
 0x7ed   :  { %v1772_v58 = vadd.f32 %v2658_v31, %v1771_v56 }
 0x7ef   :  { %v1773_v15 = vpack.c.bf16 %v1772_v58, %v1772_v58 }
 0x7f1   :  { %1774 = vst.msk [vmem:[#allocation3 + $0x18] sm:$0xf] %vm629_vm14, %v1773_v15  ;;  %2278 = vmatmul.mubr.msk.bf16.vlgmr.msra.gmra.mrb[36].mxu1 %vm523_vm12, %v1773_v15  ;;  %2468 = vmatmul.mubr.msk.bf16.vlgmr.msra.gmra.mrb[44].mxu0 %vm523_vm12, %v1773_v15 }
 0x7f2   :  { %2472 = vmatpush3.bf16.msra.mxu1 %v2587_v6  ;;  %2479 = vmatprep.mubr.msk.bf16.mxu1 %vm523_vm12, %v1968_v61 }
 0x7f3   :  { %2473 = vmatprep.subr.bf16.mxu1 %v2588_v60 }
 0x7f6   :  { %2474 = vmatpush3.bf16.msra.mxu1 %v2588_v60 }
 0x7f7   :  { %2475 = vmatprep.subr.bf16.mxu1 %v2589_v13 }
 0x7fa   :  { %2476 = vmatpush3.bf16.msra.mxu1 %v2589_v13 }
 0x7fb   :  { %2477 = vmatprep.subr.bf16.mxu1 %v2590_v59 }
 0x7fe   :  { %2478 = vmatpush3.bf16.msra.mxu1 %v2590_v59 }
 0x801   :  { %2480 = vmatmul.mubr.msk.bf16.vlgmr.msra.gmra.mrb[40].mxu1 %vm523_vm12, %v1969_v62 }
 0x802   :  { %2483 = vmatprep.mubr.msk.bf16.mxu1 %vm523_vm12, %v1970_v63 }
 0x8c4   :  { %v1895_v1 = vpop.f32.mrb[36].mxu1  ;;  %v1936_v2 = vpop.f32.mrb[44].mxu0 }
 0x8c5   :  { %v1942_v14 = vadd.f32 %v1895_v1, %v2990_v32  ;;  %v1897_v3 = vpop.f32.mrb[37].mxu1  ;;  %v2469_v16 = vpop.f32.mrb[45].mxu0 }
 0x8c6   :  { %v1943_v4 = vadd.f32 %v1897_v3, %v2992_v35  ;;  %v1899_v7 = vpop.f32.mrb[38].mxu1  ;;  %v1939_v21 = vpop.f32.mrb[46].mxu0 }
 0x8c7   :  { %v2280_v23 = vmul.f32 -1.442695, %v1942_v14  ;;  %v1900_v22 = vpop.f32.mrb[39].mxu1  ;;  %v2470_v26 = vpop.f32.mrb[47].mxu0 }
 0x8c8   :  { %v2281_v24 = vmul.f32 -1.442695, %v1943_v4 }
 0x8c9   :  { %2661 = vpow2.f32 %v2280_v23 }
 0x8ca   :  { %2663 = vpow2.f32 %v2281_v24 }
 0x8d3   :  { %v2662_v9 = vpop.eup %2661 }
 0x8d4   :  { %v1950_v27 = vadd.f32 1.0, %v2662_v9  ;;  %v2481_v28 = vpop.f32.mrb[40].mxu1  ;;  %v2664_v36 = vpop.eup %2663 }
 0x8d5   :  { %v2066_v32 = vadd.f32 %v2481_v28, %v2282_v25  ;;  %v2057_v33 = vpop.f32.mrb[41].mxu1  ;;  %v1951_v39 = vadd.f32 1.0, %v2664_v36 }
 0x8d6   :  { %2665 = vrcp.f32 %v1950_v27  ;;  %v2058_v18 = vadd.f32 %v2282_v25, %v2057_v33  ;;  %v2482_v35 = vpop.f32.mrb[42].mxu1 }
 0x8d7   :  { %2090 = vst [vmem:[%s3260_s6 + $0x10] sm:$0xff] %v2066_v32  ;;  %v2069_v29 = vadd.f32 %v2482_v35, %v2282_v25  ;;  %v2060_v11 = vpop.f32.mrb[43].mxu1 }
 0x8d8   :  { %2088 = vst [vmem:[%s3260_s6] sm:$0xff] %v2058_v18  ;;  %v2061_v0 = vadd.f32 %v2282_v25, %v2060_v11 }
 0x8d9   :  { %2091 = vst [vmem:[%s3260_s6 + $0x18] sm:$0xff] %v2069_v29 }
 0x8da   :  { %2089 = vst [vmem:[%s3260_s6 + $0x8] sm:$0xff] %v2061_v0 }
 0x8e0   :  { %v2666_v12 = vpop.eup %2665 }
 0x8e1   :  { %v1956_v37 = vmul.f32 %v2666_v12, %v1936_v2 }
 0x8e3   :  { %v1957_v38 = vadd.f32 %v2974_v17, %v1956_v37 }
 0x8e5   :  { %2667 = vtanh.f32 %v1957_v38 }
 0x8e6   :  { %2669 = vrcp.f32 %v1951_v39 }
 0x8ef   :  { %v2668_v40 = vpop.eup %2667 }
 0x8f0   :  { %v1959_v41 = vsub.f32 %v1772_v58, %v2668_v40  ;;  %v2670_v5 = vpop.eup %2669 }
 0x8f2   :  { %v1960_v6 = vmul.f32 %v2670_v5, %v1959_v41 }
 0x8f4   :  { %v1961_v43 = vadd.f32 %v2668_v40, %v1960_v6 }
 0x8f6   :  { %v1962_v8 = vpack.c.bf16 %v1961_v43, %v1961_v43  ;;  %1967 = vst.msk [vmem:[%s3261_s7] sm:$0xff] %vm523_vm12, %v1961_v43 }
 0x8f8   :  { %v1964_v45 = vrot.slane %v1962_v8, 4 }
 0x8fa   :  { %1966 = vst.msk [vmem:[#allocation3 + $0x18] sm:$0xf0] %vm822_vm15, %v1964_v45 }
 0x901   :  { %v1971_v46 = vld [vmem:[#allocation3 + $0x18] sm:$0xff] }
 0x902   :  { %2484 = vmatmul.mubr.msk.bf16.gmra.mrb[44].mxu1 %vm523_vm12, %v1971_v46 }
 0x9d5   :  { %v2485_v17 = vpop.f32.mrb[44].mxu1 }
 0x9d6   :  { %v2082_v47 = vadd.f32 %v2485_v17, %v2282_v25  ;;  %v2073_v48 = vpop.f32.mrb[45].mxu1 }
 0x9d7   :  { %v2074_v19 = vadd.f32 %v2282_v25, %v2073_v48  ;;  %v2486_v50 = vpop.f32.mrb[46].mxu1 }
 0x9d8   :  { %2094 = vst [vmem:[%s3260_s6 + $0x30] sm:$0xff] %v2082_v47  ;;  %v2085_v34 = vadd.f32 %v2486_v50, %v2282_v25  ;;  %v2076_v20 = vpop.f32.mrb[47].mxu1 }
 0x9d9   :  { %2092 = vst [vmem:[%s3260_s6 + $0x20] sm:$0xff] %v2074_v19  ;;  %v2077_v52 = vadd.f32 %v2282_v25, %v2076_v20 }
 0x9da   :  { %2095 = vst [vmem:[%s3260_s6 + $0x38] sm:$0xff] %v2085_v34 }
 0x9db   :  { %2093 = vst [vmem:[%s3260_s6 + $0x28] sm:$0xff] %v2077_v52 }
 0x9dc   :  { %2104 = vsyncpa [#allocation5], 1 }
 0x9dd   :  { %2105 = vsyncpa [#allocation7], 1 }

</bundles_post_ra>
